<compile_context>
chip_gen: v7x
topology: tpu7x:2x2x1
jax: 0.10.0
libtpu: 0.0.40
codegen_flags: <defaults>
</compile_context>

<pallas_src>
import numpy as np
import jax
import jax.numpy as jnp
from jax.experimental import pallas as pl
from jax.experimental.pallas import tpu as pltpu


def make_syngin_kernel(num_layers: int, inv_n: float):
    """Build the per-batch-tile kernel body (all sizes are static Python ints)."""

    def kernel(x_ref, a_ref, w1_ref, b1_ref, w2_ref, b2_ref, wc_ref, bc_ref,
               pool_ref, out_ref):
        # x_ref:   (TB*N, D)    bf16   2-D activation slab for this batch tile
        # a_ref:   (TB*N, TB*N) bf16   block-diagonal A_eff = I + eps*adj (residual folded in)
        # w1/w2:   bf16 weights;  b1/b2: f32 (1, H) biases
        # wc_ref:  (H, P_pad) bf16; bc_ref: (1, P_pad) f32
        # pool_ref:(TB, TB*N) bf16 0/1 block indicator (exact in bf16)
        # out_ref: (TB, P_pad) f32
        a_eff = a_ref[...]
        w1 = w1_ref[...]                      # hoisted loads (no per-layer reload)
        w2 = w2_ref[...]
        b1 = b1_ref[...]
        b2 = b2_ref[...]

        x = x_ref[...]                        # (TB*N, D) bf16
        for _ in range(num_layers):
            # Aggregation + residual in one MXU matmul: x <- (I + eps*adj) @ x.
            ag = jnp.dot(a_eff, x, preferred_element_type=jnp.float32)      # (TB*N, D) f32
            # Shared GIN MLP on the whole slab; f32 epilogue, bf16 storage between layers.
            hid = jnp.dot(ag.astype(jnp.bfloat16), w1,
                          preferred_element_type=jnp.float32) + b1
            hid = jnp.maximum(hid, 0.0)
            x = (jnp.dot(hid.astype(jnp.bfloat16), w2,
                         preferred_element_type=jnp.float32) + b2).astype(jnp.bfloat16)

        # Mean pool over nodes: 0/1 indicator matmul (exact in bf16), 1/N scale in f32.
        pooled = jnp.dot(pool_ref[...], x, preferred_element_type=jnp.float32) * inv_n
        logits = jnp.dot(pooled.astype(jnp.bfloat16), wc_ref[...],
                         preferred_element_type=jnp.float32) + bc_ref[...]
        out_ref[...] = logits                                               # lane-dense store

    return kernel


def _pick_tile_b(B: int, N: int) -> int:
    """TB*N >= 256 to fill the MXU, multiple of 8, but keep >= 2 grid steps when B allows."""
    tb = 8 * pl.cdiv(max(256, N), 8 * N)          # smallest mult-of-8 with tb*N >= 256
    half = 8 * pl.cdiv(pl.cdiv(B, 2), 8)          # ~half the batch, rounded up to 8
    return max(8, min(tb, max(8, half)))


def syngin_forward_pallas(tok, adj, params, num_layers: int, tile_b: int | None = None):
    """tok: (B, N) int32 token ids; adj: (B, N, N) fp32 adjacency."""
    emb = params["emb"]                       # (V, D)
    eps = params["eps"].reshape(()).astype(jnp.float32)
    w1, b1 = params["w1"], params["b1"]       # (D, H), (1, H)
    w2, b2 = params["w2"], params["b2"]       # (H, H), (1, H)
    wc, bc = params["wc"], params["bc"]       # (H, P), (1, P)

    B, N = tok.shape
    D = emb.shape[1]
    H = w1.shape[1]
    P = wc.shape[1]
    assert D == H, "GIN re-applies its MLP each layer, so input_dim must equal hidden_dim"

    if tile_b is None:
        tile_b = _pick_tile_b(B, N)
    tile_b = max(8, tile_b)
    B_pad = tile_b * pl.cdiv(B, tile_b)
    G = B_pad // tile_b                       # number of grid steps
    TBN = tile_b * N                          # rows per batch tile (2-D slab height)

    # --- Embedding gather stays in XLA, in bf16, flattened to the 2-D slab layout. ---
    x2d = emb.astype(jnp.bfloat16)[tok].reshape(B * N, D)          # (B*N, D) bf16
    if B_pad != B:
        x2d = jnp.pad(x2d, ((0, (B_pad - B) * N), (0, 0)))

    # --- Fold residual + eps into a block-diagonal adjacency, built in f32, cast once. ---
    adj_f = adj.astype(jnp.float32)
    if B_pad != B:
        adj_f = jnp.pad(adj_f, ((0, B_pad - B), (0, 0), (0, 0)))
    a_eff = jnp.eye(N, dtype=jnp.float32)[None, :, :] + eps * adj_f       # (B_pad, N, N)
    a_eff = a_eff.reshape(G, tile_b, N, N)
    eye_tb = jnp.eye(tile_b, dtype=jnp.float32)
    # bd[g, s*N+i, t*N+j] = delta_{s,t} * a_eff[g, s, i, j]
    a_bd = jnp.einsum("st,gsij->gsitj", eye_tb, a_eff)
    a_bd = a_bd.reshape(G * TBN, TBN).astype(jnp.bfloat16)                # lane-dense operand

    # bf16 matmul operands; biases stay f32 (accumulation is f32).
    w1_bf = w1.astype(jnp.bfloat16)
    w2_bf = w2.astype(jnp.bfloat16)
    b1_f = b1.astype(jnp.float32)
    b2_f = b2.astype(jnp.float32)

    # Lane-dense classifier: pad P to a multiple of 128 so stores are unmasked.
    P_pad = 128 * pl.cdiv(P, 128)
    wc_pad = jnp.zeros((H, P_pad), jnp.bfloat16).at[:, :P].set(wc.astype(jnp.bfloat16))
    bc_pad = jnp.zeros((1, P_pad), jnp.float32).at[:, :P].set(bc.astype(jnp.float32))

    # 0/1 block-indicator pooling matrix (exact in bf16); 1/N applied in f32 inside the kernel.
    pool_ind = jnp.repeat(jnp.eye(tile_b, dtype=jnp.bfloat16), N, axis=1)  # (TB, TB*N)

    kernel = make_syngin_kernel(num_layers, 1.0 / float(N))

    flops = int(num_layers * (2 * B_pad * N * TBN * D + 4 * B_pad * N * D * H)
                + 2 * B_pad * TBN * H + 2 * B_pad * H * P_pad)
    bytes_accessed = int(x2d.size * 2 + a_bd.size * 2
                         + (w1_bf.size + w2_bf.size + wc_pad.size + pool_ind.size) * 2
                         + (b1_f.size + b2_f.size + bc_pad.size) * 4
                         + B_pad * P_pad * 4)

    logits_pad = pl.pallas_call(
        kernel,
        out_shape=jax.ShapeDtypeStruct((B_pad, P_pad), jnp.float32),
        grid_spec=pltpu.PrefetchScalarGridSpec(
            num_scalar_prefetch=0,
            grid=(G,),
            in_specs=[
                pl.BlockSpec((TBN, D), lambda b: (b, 0)),          # x slab batch tile
                pl.BlockSpec((TBN, TBN), lambda b: (b, 0)),        # block-diag A_eff tile
                pl.BlockSpec((D, H), lambda b: (0, 0)),            # W1
                pl.BlockSpec((1, H), lambda b: (0, 0)),            # b1
                pl.BlockSpec((H, H), lambda b: (0, 0)),            # W2
                pl.BlockSpec((1, H), lambda b: (0, 0)),            # b2
                pl.BlockSpec((H, P_pad), lambda b: (0, 0)),        # Wc (lane-padded)
                pl.BlockSpec((1, P_pad), lambda b: (0, 0)),        # bc (lane-padded)
                pl.BlockSpec((tile_b, TBN), lambda b: (0, 0)),     # 0/1 pool indicator
            ],
            out_specs=pl.BlockSpec((tile_b, P_pad), lambda b: (b, 0)),
        ),
        compiler_params=pltpu.CompilerParams(
            dimension_semantics=("parallel",),
        ),
        cost_estimate=pl.CostEstimate(flops=flops, transcendentals=0,
                                      bytes_accessed=bytes_accessed),
    )(x2d, a_bd, w1_bf, b1_f, w2_bf, b2_f, wc_pad, bc_pad, pool_ind)

    return logits_pad[:B, :P], None


def reference_forward(tok, adj, params, num_layers):
    """Pure-JAX f32 reference for correctness checking."""
    x = params["emb"][tok].astype(jnp.float32)
    eps = params["eps"][0, 0]
    for _ in range(num_layers):
        x = x + eps * jnp.einsum("bij,bjd->bid", adj, x)
        h = jnp.maximum(x @ params["w1"] + params["b1"], 0.0)
        x = h @ params["w2"] + params["b2"]
    pooled = x.mean(axis=1)
    return pooled @ params["wc"] + params["bc"]


if __name__ == "__main__":
    # Small, forward-consistent shapes. B chosen so tile_b=32 -> TB*N = 256 and grid = 2
    # (both v7x TensorCores get a tile; single fat step per core).
    B, N = 64, 8          # batch, sequence/nodes
    V = 50                # vocab size
    D = 32                # opt.input_dim
    H = 32                # opt.hidden_dim (must equal D: GIN reuses its MLP each layer)
    P = 3                 # opt.polarities_dim
    NUM_LAYERS = 2        # opt.num_layers

    key = jax.random.PRNGKey(0)
    k_emb, k_w1, k_b1, k_w2, k_b2, k_wc, k_bc, k_tok, k_adj = jax.random.split(key, 9)

    params = {
        "emb": jax.random.normal(k_emb, (V, D), dtype=jnp.float32) * 0.1,
        # GIN.epsilon is initialized to 0.0 in the module; a nonzero "trained" value is used
        # here so the adjacency aggregation path is actually exercised by the test.
        "eps": jnp.full((1, 1), 0.05, dtype=jnp.float32),
        "w1": jax.random.normal(k_w1, (D, H), dtype=jnp.float32) * 0.1,
        "b1": jax.random.normal(k_b1, (1, H), dtype=jnp.float32) * 0.1,
        "w2": jax.random.normal(k_w2, (H, H), dtype=jnp.float32) * 0.1,
        "b2": jax.random.normal(k_b2, (1, H), dtype=jnp.float32) * 0.1,
        "wc": jax.random.normal(k_wc, (H, P), dtype=jnp.float32) * 0.1,
        "bc": jax.random.normal(k_bc, (1, P), dtype=jnp.float32) * 0.1,
    }

    tok = jax.random.randint(k_tok, (B, N), 0, V, dtype=jnp.int32)
    adj_raw = jax.random.uniform(k_adj, (B, N, N), dtype=jnp.float32)
    adj = (adj_raw > 0.5).astype(jnp.float32)   # binary adjacency

    logits, _ = syngin_forward_pallas(tok, adj, params, NUM_LAYERS)
    logits = jax.block_until_ready(logits)

    ref = reference_forward(tok, adj, params, NUM_LAYERS)
    assert logits.shape == (B, P)
    # bf16 matmul operands with f32 accumulation -> relaxed tolerance vs. f32 reference.
    np.testing.assert_allclose(np.asarray(logits), np.asarray(ref), rtol=2e-2, atol=2e-2)

    print("KERNEL_OK")
</pallas_src>

<mosaic_0001>
module attributes {stable_mosaic.version = 11 : i64} {
  func.func @kernel(%arg0: i32, %arg1: memref<256x32xbf16, #tpu.memory_space<vmem>>, %arg2: memref<256x256xbf16, #tpu.memory_space<vmem>>, %arg3: memref<32x32xbf16, #tpu.memory_space<vmem>>, %arg4: memref<1x32xf32, #tpu.memory_space<vmem>>, %arg5: memref<32x32xbf16, #tpu.memory_space<vmem>>, %arg6: memref<1x32xf32, #tpu.memory_space<vmem>>, %arg7: memref<32x128xbf16, #tpu.memory_space<vmem>>, %arg8: memref<1x128xf32, #tpu.memory_space<vmem>>, %arg9: memref<32x256xbf16, #tpu.memory_space<vmem>>, %arg10: memref<32x128xf32, #tpu.memory_space<vmem>>) attributes {dimension_semantics = [#tpu.dimension_semantics<parallel>], iteration_bounds = array<i64: 2>, scalar_prefetch = 0 : i64, scratch_operands = 0 : i64, tpu.core_type = #tpu.core_type<tc>, window_params = [{transform_indices = @transform_0, window_bounds = array<i64: 256, 32>}, {transform_indices = @transform_1, window_bounds = array<i64: 256, 256>}, {pipeline_mode = #tpu.pipeline_mode<synchronous>, transform_indices = @transform_2, window_bounds = array<i64: 32, 32>}, {pipeline_mode = #tpu.pipeline_mode<synchronous>, transform_indices = @transform_3, window_bounds = array<i64: 1, 32>}, {pipeline_mode = #tpu.pipeline_mode<synchronous>, transform_indices = @transform_4, window_bounds = array<i64: 32, 32>}, {pipeline_mode = #tpu.pipeline_mode<synchronous>, transform_indices = @transform_5, window_bounds = array<i64: 1, 32>}, {pipeline_mode = #tpu.pipeline_mode<synchronous>, transform_indices = @transform_6, window_bounds = array<i64: 32, 128>}, {pipeline_mode = #tpu.pipeline_mode<synchronous>, transform_indices = @transform_7, window_bounds = array<i64: 1, 128>}, {pipeline_mode = #tpu.pipeline_mode<synchronous>, transform_indices = @transform_8, window_bounds = array<i64: 32, 256>}, {transform_indices = @transform_9, window_bounds = array<i64: 32, 128>}]} {
    %c0 = arith.constant 0 : index
    %c0_0 = arith.constant 0 : index
    %0 = vector.load %arg2[%c0, %c0_0] : memref<256x256xbf16, #tpu.memory_space<vmem>>, vector<256x256xbf16>
    %c0_1 = arith.constant 0 : index
    %c0_2 = arith.constant 0 : index
    %1 = vector.load %arg3[%c0_1, %c0_2] : memref<32x32xbf16, #tpu.memory_space<vmem>>, vector<32x32xbf16>
    %c0_3 = arith.constant 0 : index
    %c0_4 = arith.constant 0 : index
    %2 = vector.load %arg5[%c0_3, %c0_4] : memref<32x32xbf16, #tpu.memory_space<vmem>>, vector<32x32xbf16>
    %c0_5 = arith.constant 0 : index
    %c0_6 = arith.constant 0 : index
    %3 = vector.load %arg4[%c0_5, %c0_6] : memref<1x32xf32, #tpu.memory_space<vmem>>, vector<1x32xf32>
    %c0_7 = arith.constant 0 : index
    %c0_8 = arith.constant 0 : index
    %4 = vector.load %arg6[%c0_7, %c0_8] : memref<1x32xf32, #tpu.memory_space<vmem>>, vector<1x32xf32>
    %c0_9 = arith.constant 0 : index
    %c0_10 = arith.constant 0 : index
    %5 = vector.load %arg1[%c0_9, %c0_10] : memref<256x32xbf16, #tpu.memory_space<vmem>>, vector<256x32xbf16>
    %cst = arith.constant dense<0.000000e+00> : vector<256x32xf32>
    %6 = tpu.matmul %0, %5, %cst {dimension_numbers = #tpu.dot_dimension_numbers<[1], [0], [0], [1], [0, 0, 1, 1], [], []>} : vector<256x256xbf16>, vector<256x32xbf16>, vector<256x32xf32> -> vector<256x32xf32>
    %7 = arith.truncf %6 : vector<256x32xf32> to vector<256x32xbf16>
    %cst_11 = arith.constant dense<0.000000e+00> : vector<256x32xf32>
    %8 = tpu.matmul %7, %1, %cst_11 {dimension_numbers = #tpu.dot_dimension_numbers<[1], [0], [0], [1], [0, 0, 1, 1], [], []>} : vector<256x32xbf16>, vector<32x32xbf16>, vector<256x32xf32> -> vector<256x32xf32>
    %9 = vector.broadcast %3 : vector<1x32xf32> to vector<256x32xf32>
    %10 = arith.addf %8, %9 : vector<256x32xf32>
    %cst_12 = arith.constant 0.000000e+00 : f32
    %11 = vector.broadcast %cst_12 : f32 to vector<256x32xf32>
    %12 = arith.maximumf %10, %11 : vector<256x32xf32>
    %13 = arith.truncf %12 : vector<256x32xf32> to vector<256x32xbf16>
    %cst_13 = arith.constant dense<0.000000e+00> : vector<256x32xf32>
    %14 = tpu.matmul %13, %2, %cst_13 {dimension_numbers = #tpu.dot_dimension_numbers<[1], [0], [0], [1], [0, 0, 1, 1], [], []>} : vector<256x32xbf16>, vector<32x32xbf16>, vector<256x32xf32> -> vector<256x32xf32>
    %15 = vector.broadcast %4 : vector<1x32xf32> to vector<256x32xf32>
    %16 = arith.addf %14, %15 : vector<256x32xf32>
    %17 = arith.truncf %16 : vector<256x32xf32> to vector<256x32xbf16>
    %cst_14 = arith.constant dense<0.000000e+00> : vector<256x32xf32>
    %18 = tpu.matmul %0, %17, %cst_14 {dimension_numbers = #tpu.dot_dimension_numbers<[1], [0], [0], [1], [0, 0, 1, 1], [], []>} : vector<256x256xbf16>, vector<256x32xbf16>, vector<256x32xf32> -> vector<256x32xf32>
    %19 = arith.truncf %18 : vector<256x32xf32> to vector<256x32xbf16>
    %cst_15 = arith.constant dense<0.000000e+00> : vector<256x32xf32>
    %20 = tpu.matmul %19, %1, %cst_15 {dimension_numbers = #tpu.dot_dimension_numbers<[1], [0], [0], [1], [0, 0, 1, 1], [], []>} : vector<256x32xbf16>, vector<32x32xbf16>, vector<256x32xf32> -> vector<256x32xf32>
    %21 = vector.broadcast %3 : vector<1x32xf32> to vector<256x32xf32>
    %22 = arith.addf %20, %21 : vector<256x32xf32>
    %cst_16 = arith.constant 0.000000e+00 : f32
    %23 = vector.broadcast %cst_16 : f32 to vector<256x32xf32>
    %24 = arith.maximumf %22, %23 : vector<256x32xf32>
    %25 = arith.truncf %24 : vector<256x32xf32> to vector<256x32xbf16>
    %cst_17 = arith.constant dense<0.000000e+00> : vector<256x32xf32>
    %26 = tpu.matmul %25, %2, %cst_17 {dimension_numbers = #tpu.dot_dimension_numbers<[1], [0], [0], [1], [0, 0, 1, 1], [], []>} : vector<256x32xbf16>, vector<32x32xbf16>, vector<256x32xf32> -> vector<256x32xf32>
    %27 = vector.broadcast %4 : vector<1x32xf32> to vector<256x32xf32>
    %28 = arith.addf %26, %27 : vector<256x32xf32>
    %29 = arith.truncf %28 : vector<256x32xf32> to vector<256x32xbf16>
    %c0_18 = arith.constant 0 : index
    %c0_19 = arith.constant 0 : index
    %30 = vector.load %arg9[%c0_18, %c0_19] : memref<32x256xbf16, #tpu.memory_space<vmem>>, vector<32x256xbf16>
    %cst_20 = arith.constant dense<0.000000e+00> : vector<32x32xf32>
    %31 = tpu.matmul %30, %29, %cst_20 {dimension_numbers = #tpu.dot_dimension_numbers<[1], [0], [0], [1], [0, 0, 1, 1], [], []>} : vector<32x256xbf16>, vector<256x32xbf16>, vector<32x32xf32> -> vector<32x32xf32>
    %cst_21 = arith.constant 1.250000e-01 : f32
    %32 = vector.broadcast %cst_21 : f32 to vector<32x32xf32>
    %33 = arith.mulf %31, %32 : vector<32x32xf32>
    %34 = arith.truncf %33 : vector<32x32xf32> to vector<32x32xbf16>
    %c0_22 = arith.constant 0 : index
    %c0_23 = arith.constant 0 : index
    %35 = vector.load %arg7[%c0_22, %c0_23] : memref<32x128xbf16, #tpu.memory_space<vmem>>, vector<32x128xbf16>
    %cst_24 = arith.constant dense<0.000000e+00> : vector<32x128xf32>
    %36 = tpu.matmul %34, %35, %cst_24 {dimension_numbers = #tpu.dot_dimension_numbers<[1], [0], [0], [1], [0, 0, 1, 1], [], []>} : vector<32x32xbf16>, vector<32x128xbf16>, vector<32x128xf32> -> vector<32x128xf32>
    %c0_25 = arith.constant 0 : index
    %c0_26 = arith.constant 0 : index
    %37 = vector.load %arg8[%c0_25, %c0_26] : memref<1x128xf32, #tpu.memory_space<vmem>>, vector<1x128xf32>
    %38 = vector.broadcast %37 : vector<1x128xf32> to vector<32x128xf32>
    %39 = arith.addf %36, %38 : vector<32x128xf32>
    %c0_27 = arith.constant 0 : index
    %c0_28 = arith.constant 0 : index
    %40 = vector.load %arg10[%c0_27, %c0_28] : memref<32x128xf32, #tpu.memory_space<vmem>>, vector<32x128xf32>
    tpu.vector_store %arg10[%c0_27, %c0_28], %39 {strides = array<i32>} : memref<32x128xf32, #tpu.memory_space<vmem>>, vector<32x128xf32>,
    return
  }
  func.func @transform_0(%arg0: i32) -> (i32, i32) {
    %c0_i32 = arith.constant 0 : i32
    %c0_i32_0 = arith.constant 0 : i32
    return %arg0, %c0_i32 : i32, i32
  }
  func.func @transform_1(%arg0: i32) -> (i32, i32) {
    %c0_i32 = arith.constant 0 : i32
    %c0_i32_0 = arith.constant 0 : i32
    return %arg0, %c0_i32 : i32, i32
  }
  func.func @transform_2(%arg0: i32) -> (i32, i32) {
    %c0_i32 = arith.constant 0 : i32
    %c0_i32_0 = arith.constant 0 : i32
    %c0_i32_1 = arith.constant 0 : i32
    return %c0_i32, %c0_i32_0 : i32, i32
  }
  func.func @transform_3(%arg0: i32) -> (i32, i32) {
    %c0_i32 = arith.constant 0 : i32
    %c0_i32_0 = arith.constant 0 : i32
    %c0_i32_1 = arith.constant 0 : i32
    return %c0_i32, %c0_i32_0 : i32, i32
  }
  func.func @transform_4(%arg0: i32) -> (i32, i32) {
    %c0_i32 = arith.constant 0 : i32
    %c0_i32_0 = arith.constant 0 : i32
    %c0_i32_1 = arith.constant 0 : i32
    return %c0_i32, %c0_i32_0 : i32, i32
  }
  func.func @transform_5(%arg0: i32) -> (i32, i32) {
    %c0_i32 = arith.constant 0 : i32
    %c0_i32_0 = arith.constant 0 : i32
    %c0_i32_1 = arith.constant 0 : i32
    return %c0_i32, %c0_i32_0 : i32, i32
  }
  func.func @transform_6(%arg0: i32) -> (i32, i32) {
    %c0_i32 = arith.constant 0 : i32
    %c0_i32_0 = arith.constant 0 : i32
    %c0_i32_1 = arith.constant 0 : i32
    return %c0_i32, %c0_i32_0 : i32, i32
  }
  func.func @transform_7(%arg0: i32) -> (i32, i32) {
    %c0_i32 = arith.constant 0 : i32
    %c0_i32_0 = arith.constant 0 : i32
    %c0_i32_1 = arith.constant 0 : i32
    return %c0_i32, %c0_i32_0 : i32, i32
  }
  func.func @transform_8(%arg0: i32) -> (i32, i32) {
    %c0_i32 = arith.constant 0 : i32
    %c0_i32_0 = arith.constant 0 : i32
    %c0_i32_1 = arith.constant 0 : i32
    return %c0_i32, %c0_i32_0 : i32, i32
  }
  func.func @transform_9(%arg0: i32) -> (i32, i32) {
    %c0_i32 = arith.constant 0 : i32
    %c0_i32_0 = arith.constant 0 : i32
    return %arg0, %c0_i32 : i32, i32
  }
}

</mosaic_0001>

<bundles_post_ra>
// kernel: tpu_custom_call.1
= control target key start
LH: loop header
LB: loop body
LE: loop exit
PB: predicated region body
PF: predicated region fallthrough
CT: control target
= control target key end

     0   :  { %14 = vsyncpa [#allocation3], 0  ;;  %s3828_s0 = inlined_call_operand.vmem [shape: bf16[512,32], index: 0, kind: input, shape index: {}]   ;;  %s3829_s1 = inlined_call_operand.hbm [shape: bf16[512,256], index: 1, kind: input, shape index: {}]   ;;  %s3830_s2 = inlined_call_operand.vmem [shape: bf16[32,32], index: 2, kind: input, shape index: {}]   ;;  %s3831_s3 = inlined_call_operand.vmem [shape: f32[1,32], index: 3, kind: input, shape index: {}]   ;;  %s3832_s4 = inlined_call_operand.vmem [shape: bf16[32,32], index: 4, kind: input, shape index: {}]   ;;  %s3833_s5 = inlined_call_operand.vmem [shape: f32[1,32], index: 5, kind: input, shape index: {}]   ;;  %s3834_s6 = inlined_call_operand.vmem [shape: bf16[32,128], index: 6, kind: input, shape index: {}]   ;;  %s3835_s7 = inlined_call_operand.vmem [shape: f32[1,128], index: 7, kind: input, shape index: {}]   ;;  %s3836_s8 = inlined_call_operand.vmem [shape: bf16[32,256], index: 8, kind: input, shape index: {}]   ;;  %s3837_s9 = inlined_call_operand.hbm [shape: f32[64,128], index: 9, kind: output, shape index: {}]  }
   0x1   :  { %16 = vsyncpa [#allocation3 + $0x1], 0 }
   0x2   :  { %17 = vsyncpa [#allocation4], 0 }
   0x3   :  { %19 = vsyncpa [#allocation4 + $0x1], 0  ;;  %s3229_s30 = smov 0   ;;  %s3231_s10 = smov 0  }
   0x4   :  { %s3233_s11 = smov 0   ;;  %s3235_s12 = smov 0  }
   0x5 LB: > { %s3250_s13 = sadd.s32 4294967295, %s3171_s12   ;;  %s2322_s14 = sadd.s32 4294967294, %s3171_s12   ;;  %s3171_s12 = sphi %s3235_s12, %s3850_s12   ;;  %s3167_s11 = sphi %s3233_s11, %s3849_s11   ;;  %s3163_s10 = sphi %s3231_s10, %s3848_s10   ;;  %s3159_s30 = sphi %s3229_s30, %s3847_s30  }
   0x6   : > { %s3254_s15 = sadd.s32 1, %s3171_s12   ;;  %s58_s16 = sadd.s32 1, %s3167_s11 }
   0x7   : > { %s55_s17 = ssub.s32 %s3171_s12, %s3254_s15  ;;  %p65_p0 = scmp.ne.s32.totalorder %s3167_s11, %s3163_s10 }
   0x8   : > { %p56_p1 = scmp.eq.s32.totalorder %s55_s17, 0  ;;  %p66_p2 = scmp.eq.s32.totalorder %s3171_s12, 0 }
   0x9   : > { %p71_p3 = scmp.ne.s32.totalorder %s3163_s10, %s3159_s30  ;;  %p72_p4 = scmp.eq.s32.totalorder %s3250_s13, 0 }
   0xa   : > { %s3266_s18 = scalar_select %p56_p1, %s3167_s11, %s58_s16  }
   0xb   : > { %p3268_p5 = por %p66_p2, %p65_p0  ;;  %p3272_p6 = por %p72_p4, %p71_p3 }
   0xc   : > { %p242_p7 = scmp.eq.s32.totalorder %s3250_s13, 1  ;;  %p248_p8 = scmp.eq.s32.totalorder %s2322_s14, 1 }
   0xd   : > { %p2961_p10 = scmp.lt.s32.totalorder %s3171_s12, 2  ;;  %s298_s23 = sand.u32 1, %s3167_s11  }
   0xe   : > { %p3279_p11 = por %p242_p7, %p65_p0  ;;  %p3283_p12 = por %p248_p8, %p71_p3 }
   0xf   : > { %s2467_s24 = sshll.u32 %s3171_s12, 12  ;;  %s2325_s25 = sshll.u32 %s298_s23, 8 }
  0x10   : > { %s3841_s21 = scalar_select %p3279_p11, 1, 0 }
  0x11   : > { %s3842_s22 = scalar_select %p3283_p12, 1, 0 }
  0x12   : > { %s3292_s28 = scalar_lea.hbm %s3829_s1, %s2467_s24  ;;  %s302_s29 = scalar_lea.vmem [#allocation2], %s2325_s25 }
  0x13   : > { %s310_s14 = sshll.u32 %s302_s29, 4  ;;  %p3296_p13 = pnand %p2961_p10, %p3268_p5  ;;  %s3300_s14 = int_to_ptr.vmem [resolvable:$true] %s310_s14 }
  0x14   : > { %s3302_s17 = scalar_lea.sflag [#allocation3], %s298_s23  ;;  %s3075_s26 = scalar_lea.hbm %s3292_s28, 4096 }
  0x15   : > { %p3076_p0 = scmp.ne.s32.totalorder %s3292_s28, %s3075_s26  ;;  %p3077_p1 = pneg %p3296_p13 }
  0x16   : > { %s3080_s25 = scalar_lea.hbm %s3829_s1, 8192  ;;  %p3081_p4 = scmp.lt.u32.totalorder %s3292_s28, %s3829_s1 }
  0x17   : > { %p3078_p2 = pnand %p3077_p1, %p3076_p0  ;;  %p3082_p5 = scmp.lt.u32.totalorder %s3080_s25, %s3075_s26 }
  0x18   : > { %p3084_p8 = scmp.lt.u32.totalorder %s3075_s26, %s3292_s28 }
  0x19   : > { %p3079_p3 = pneg %p3078_p2  ;;  %p3083_p7 = por %p3082_p5, %p3081_p4 }
  0x1b   : > { %p3085_p10 = por %p3084_p8, %p3083_p7 }
  0x1d   : > { %p3086_p9 = pnand %p3085_p10, %p3079_p3 }
  0x1f   : > { %3089 = shalt.err (!%p3086_p9)
}
  0x20   : > { %s3090_s23 = scalar_lea.vmem %s3300_s14, 4096  ;;  %s3173_s24 = smov [#allocation2]  }
  0x21   : > { %p3091_p0 = scmp.ne.s32.totalorder %s3300_s14, %s3090_s23  ;;  %s3095_s19 = sshll.u32 %s3173_s24, 4  ;;  %s3096_s19 = int_to_ptr.vmem [resolvable:$false] %s3095_s19 }
  0x22   : > { %s3097_s27 = scalar_lea.vmem %s3096_s19, 8192  ;;  %p3098_p11 = scmp.lt.s32.totalorder %s3300_s14, %s3096_s19 }
  0x23   : > { %p3093_p2 = pnand %p3091_p0, %p3077_p1  ;;  %p3099_p4 = scmp.lt.s32.totalorder %s3097_s27, %s3090_s23 }
  0x25   : > { %p3094_p12 = pneg %p3093_p2  ;;  %p3100_p5 = por %p3099_p4, %p3098_p11 }
  0x27   : > { %p3101_p7 = pnand %p3100_p5, %p3094_p12 }
  0x29   : > { %3104 = shalt.err (!%p3101_p7)
}
  0x2a   : > { %s3174_s26 = smov 128   ;;  %s3175_s25 = smov 8  }
  0x2b   : > { %2956 = dma.hbm_to_vmem [thread:$0]  (!%p3296_p13), %s3292_s28, 4096, %s3300_s14, %s3302_s17, %s3174_s26, %s3174_s26, %s3175_s25  }
  0x2c   : > { %p2329_p9 = scmp.ge.s32.totalorder %s3171_s12, 1  ;;  %p318_p1 = scmp.lt.s32.totalorder %s3171_s12, 3 }
  0x2e   : > { %p319_p3 = pnand %p2329_p9, %p318_p1 }
  0x2f   : > { %s3333_s29 = sand.u32 (!%p319_p3), 1, %s3163_s10  }
  0x30   : > { %322 = sbr.rel (%p319_p3) target bundleno = 2132 (0x854), region = 56  ;;  %s2330_s23 = sshll.u32 (!%p319_p3), %s3333_s29, 8 }
  0x31   : > { %s325_s24 = scalar_lea.sflag (!%p319_p3), [#allocation3], %s3333_s29  ;;  %s3337_s19 = scalar_lea.vmem (!%p319_p3), [#allocation2], %s2330_s23 }
  0x37   : > { %3150 = dma.done.wait (%p3272_p6), %s325_s24, 4096  }
  0x38   : > { %3152 = vsyncadd (%p3272_p6), %s325_s24, 4294963200  ;;  %s2332_s28 = sshll.u32 %s3250_s13, 5  ;;  %v3361_v11 = vld [vmem:[%s3337_s19 + $0x4] ss:$8 sps:$4 sm:$0xff]   ;;  %v3370_v17 = vld [vmem:[%s3337_s19] ss:$8 sps:$4 sm:$0xff]  }
  0x39   : > { %p369_p11 = scmp.lt.s32.totalorder %s2332_s28, 63  ;;  %739 = vmatprep.mubr.bf16.mxu0 %v3361_v11  ;;  %v3373_v18 = vld [vmem:[%s3337_s19 + $0x14] ss:$8 sps:$4 sm:$0xff]   ;;  %v3378_v19 = vld [vmem:[%s3337_s19 + $0x10] ss:$8 sps:$4 sm:$0xff]   ;;  %v3063_v41 = vld [vmem:[%s3830_s2] sm:$0xff]  }
  0x3a   : > { %v3381_v20 = vld [vmem:[%s3337_s19 + $0x24] ss:$8 sps:$4 sm:$0xff]   ;;  %v3386_v21 = vld [vmem:[%s3337_s19 + $0x20] ss:$8 sps:$4 sm:$0xff]   ;;  %v3389_v22 = vld [vmem:[%s3337_s19 + $0x34] ss:$8 sps:$4 sm:$0xff]   ;;  %2797 = vmatprep.subr.bf16.mxu1 %v3063_v41 }
  0x3b   : > { %s3852_s28 = smov (!%p369_p11, %s2332_s28), 63  ;;  %v3394_v23 = vld [vmem:[%s3337_s19 + $0x30] ss:$8 sps:$4 sm:$0xff]   ;;  %v3397_v24 = vld [vmem:[%s3337_s19 + $0x44] ss:$8 sps:$4 sm:$0xff]   ;;  %2798 = vmatpush3.bf16.msra.mxu1 %v3063_v41  ;;  %vm902_vm0 = vcmask 261120  }
  0x3c   : > { %s2333_s14 = sshll.u32 %s3852_s28, 2  ;;  %v3402_v25 = vld [vmem:[%s3337_s19 + $0x40] ss:$8 sps:$4 sm:$0xff]   ;;  %v3405_v26 = vld [vmem:[%s3337_s19 + $0x54] ss:$8 sps:$4 sm:$0xff]   ;;  %s2331_s25 = sshll.u32 %s3333_s29, 5 }
  0x3d   : > { %s3347_s27 = scalar_lea.vmem %s3828_s0, %s2333_s14  ;;  %v3410_v27 = vld [vmem:[%s3337_s19 + $0x50] ss:$8 sps:$4 sm:$0xff]   ;;  %v3413_v28 = vld [vmem:[%s3337_s19 + $0x64] ss:$8 sps:$4 sm:$0xff]   ;;  %v3418_v29 = vld [vmem:[%s3337_s19 + $0x60] ss:$8 sps:$4 sm:$0xff]  }
  0x3e   : > { %v2999_v0 = vld [vmem:[%s3347_s27 + $0x40] sm:$0xff]   ;;  %v3001_v2 = vld [vmem:[%s3347_s27 + $0x48] sm:$0xff]   ;;  %v3003_v4 = vld [vmem:[%s3347_s27 + $0x50] sm:$0xff]   ;;  %s2468_s14 = sshll.u32 %s3250_s13, 9  ;;  %s2224_s13 = scalar_lea.sflag [#allocation4], %s3333_s29 }
  0x3f   : > { %v3000_v1 = vld [vmem:[%s3347_s27] sm:$0xff]   ;;  %2469 = vmatprep.subr.bf16.mxu0 %v2999_v0  ;;  %v3002_v3 = vld [vmem:[%s3347_s27 + $0x8] sm:$0xff]   ;;  %v3004_v5 = vld [vmem:[%s3347_s27 + $0x10] sm:$0xff]   ;;  %p3844_p12 = scmp.ne.s32.totalorder %s3841_s21, 0  ;;  %s3176_s26 = smov [#allocation5]  }
  0x40   : > { %2470 = vmatpush3.bf16.msra.mxu0 %v3000_v1  ;;  %v3005_v6 = vld [vmem:[%s3347_s27 + $0x58] sm:$0xff]   ;;  %v3007_v8 = vld [vmem:[%s3347_s27 + $0x60] sm:$0xff]   ;;  %v3009_v10 = vld [vmem:[%s3347_s27 + $0x68] sm:$0xff]  }
  0x41   : > { %2471 = vmatprep.subr.bf16.mxu0 %v3001_v2  ;;  %v3006_v7 = vld [vmem:[%s3347_s27 + $0x18] sm:$0xff]   ;;  %v3008_v9 = vld [vmem:[%s3347_s27 + $0x20] sm:$0xff]   ;;  %v3010_v12 = vld [vmem:[%s3347_s27 + $0x28] sm:$0xff]  }
  0x42   : > { %v3011_v13 = vld [vmem:[%s3347_s27 + $0x70] sm:$0xff]   ;;  %v3013_v15 = vld [vmem:[%s3347_s27 + $0x78] sm:$0xff]   ;;  %v3429_v32 = vld [vmem:[%s3337_s19 + $0x84] ss:$8 sps:$4 sm:$0xff]  }
  0x43   : > { %v3012_v14 = vld [vmem:[%s3347_s27 + $0x30] sm:$0xff]   ;;  %v3014_v16 = vld [vmem:[%s3347_s27 + $0x38] sm:$0xff]   ;;  %v3434_v33 = vld [vmem:[%s3337_s19 + $0x80] ss:$8 sps:$4 sm:$0xff]   ;;  %s3784_s27 = scalar_lea.hbm %s3837_s9, %s2468_s14 }
  0x44   : > { %2472 = vmatpush3.bf16.msra.mxu0 %v3002_v3  ;;  %v3421_v30 = vld [vmem:[%s3337_s19 + $0x74] ss:$8 sps:$4 sm:$0xff]   ;;  %v3426_v31 = vld [vmem:[%s3337_s19 + $0x70] ss:$8 sps:$4 sm:$0xff]   ;;  %v3445_v36 = vld [vmem:[%s3337_s19 + $0xa4] ss:$8 sps:$4 sm:$0xff]  }
  0x45   : > { %2473 = vmatprep.subr.bf16.mxu0 %v3003_v4  ;;  %v3437_v34 = vld [vmem:[%s3337_s19 + $0x94] ss:$8 sps:$4 sm:$0xff]   ;;  %v3442_v35 = vld [vmem:[%s3337_s19 + $0x90] ss:$8 sps:$4 sm:$0xff]   ;;  %v3450_v37 = vld [vmem:[%s3337_s19 + $0xa0] ss:$8 sps:$4 sm:$0xff]  }
  0x46   : > { %v3453_v38 = vld [vmem:[%s3337_s19 + $0xb4] ss:$8 sps:$4 sm:$0xff]   ;;  %v3458_v39 = vld [vmem:[%s3337_s19 + $0xb0] ss:$8 sps:$4 sm:$0xff]   ;;  %v3461_v40 = vld [vmem:[%s3337_s19 + $0xc4] ss:$8 sps:$4 sm:$0xff]  }
  0x47   : > { %v3469_v42 = vld [vmem:[%s3337_s19 + $0xc0] ss:$8 sps:$4 sm:$0xff]   ;;  %v3472_v43 = vld [vmem:[%s3337_s19 + $0xd4] ss:$8 sps:$4 sm:$0xff]   ;;  %v3480_v45 = vld [vmem:[%s3337_s19 + $0xd0] ss:$8 sps:$4 sm:$0xff]  }
  0x48   : > { %2474 = vmatpush3.bf16.msra.mxu0 %v3004_v5  ;;  %v3064_v44 = vld [vmem:[%s3830_s2 + $0x8] sm:$0xff]   ;;  %v3491_v48 = vld [vmem:[%s3337_s19 + $0xf4] ss:$8 sps:$4 sm:$0xff]   ;;  %v3496_v49 = vld [vmem:[%s3337_s19 + $0xf0] ss:$8 sps:$4 sm:$0xff]  }
  0x49   : > { %2475 = vmatprep.subr.bf16.mxu0 %v3005_v6  ;;  %2799 = vmatprep.subr.bf16.mxu1 %v3064_v44  ;;  %v3483_v46 = vld [vmem:[%s3337_s19 + $0xe4] ss:$8 sps:$4 sm:$0xff]   ;;  %v3488_v47 = vld [vmem:[%s3337_s19 + $0xe0] ss:$8 sps:$4 sm:$0xff]   ;;  %s367_s19 = scalar_lea.vmem [#allocation5], %s2331_s25  ;;  %s3109_s25 = sshll.u32 %s3176_s26, 4  ;;  %s3110_s25 = int_to_ptr.vmem [resolvable:$false] %s3109_s25 }
  0x4a   : > { %2800 = vmatpush3.bf16.msra.mxu1 %v3064_v44  ;;  %s2237_s28 = sshll.u32 %s367_s19, 4  ;;  %s3111_s23 = scalar_lea.vmem %s3110_s25, 1024  ;;  %s3779_s28 = int_to_ptr.vmem [resolvable:$true] %s2237_s28 }
  0x4b   : > { %s3105_s20 = scalar_lea.vmem %s3779_s28, 512  ;;  %p3112_p10 = scmp.lt.s32.totalorder %s3779_s28, %s3110_s25 }
  0x4c   : > { %2476 = vmatpush3.bf16.msra.mxu0 %v3006_v7  ;;  %p3106_p6 = scmp.ne.s32.totalorder %s3779_s28, %s3105_s20  ;;  %p3113_p0 = scmp.lt.s32.totalorder %s3111_s23, %s3105_s20 }
  0x4d   : > { %2477 = vmatprep.subr.bf16.mxu0 %v3007_v8 }
  0x4e   : > { %p3107_p13 = pnand %p3106_p6, %p3844_p12  ;;  %p3114_p2 = por %p3113_p0, %p3112_p10 }
  0x50   : > { %2478 = vmatpush3.bf16.msra.mxu0 %v3008_v9  ;;  %p3108_p8 = pneg %p3107_p13 }
  0x51   : > { %2479 = vmatprep.subr.bf16.mxu0 %v3009_v10 }
  0x52   : > { %p3115_p4 = pnand %p3114_p2, %p3108_p8 }
  0x54   : > { %2480 = vmatpush3.bf16.msra.mxu0 %v3010_v12 }
  0x55   : > { %2481 = vmatprep.subr.bf16.mxu0 %v3011_v13 }
  0x58   : > { %2482 = vmatpush3.bf16.msra.mxu0 %v3012_v14 }
  0x59   : > { %2483 = vmatprep.subr.bf16.mxu0 %v3013_v15 }
  0x5c   : > { %2484 = vmatpush3.bf16.msra.mxu0 %v3014_v16 }
  0x5d   : > { %2869 = vmatprep.subr.bf16.mxu0 %v3063_v41 }
  0x5f   : > { %740 = vmatmul.mubr.bf16.vlgmr.msra.gmra.mrb[0].mxu0 %v3370_v17 }
  0x60   : > { %747 = vmatprep.mubr.bf16.mxu0 %v3373_v18  ;;  %2870 = vmatpush3.bf16.msra.mxu0 %v3063_v41 }
  0x61   : > { %2871 = vmatprep.subr.bf16.mxu0 %v3064_v44 }
  0x64   : > { %2872 = vmatpush3.bf16.msra.mxu0 %v3064_v44 }
  0x67   : > { %748 = vmatmul.mubr.bf16.gmra.mrb[4].mxu0 %v3378_v19 }
  0x68   : > { %755 = vmatprep.mubr.bf16.mxu0 %v3381_v20 }
  0x6f   : > { %756 = vmatmul.mubr.bf16.gmra.mrb[8].mxu0 %v3386_v21 }
  0x70   : > { %763 = vmatprep.mubr.bf16.mxu0 %v3389_v22 }
  0x77   : > { %764 = vmatmul.mubr.bf16.gmra.mrb[12].mxu0 %v3394_v23 }
  0x78   : > { %771 = vmatprep.mubr.bf16.mxu0 %v3397_v24 }
  0x7f   : > { %772 = vmatmul.mubr.bf16.gmra.mrb[16].mxu0 %v3402_v25 }
  0x80   : > { %779 = vmatprep.mubr.bf16.mxu0 %v3405_v26 }
  0x87   : > { %780 = vmatmul.mubr.bf16.gmra.mrb[20].mxu0 %v3410_v27 }
  0x88   : > { %787 = vmatprep.mubr.bf16.mxu0 %v3413_v28 }
  0x8f   : > { %788 = vmatmul.mubr.bf16.gmra.mrb[24].mxu0 %v3418_v29 }
  0x90   : > { %795 = vmatprep.mubr.bf16.mxu0 %v3421_v30 }
  0x97   : > { %796 = vmatmul.mubr.bf16.gmra.mrb[28].mxu0 %v3426_v31 }
  0x98   : > { %803 = vmatprep.mubr.bf16.mxu0 %v3429_v32 }
  0x9f   : > { %804 = vmatmul.mubr.bf16.gmra.mrb[32].mxu0 %v3434_v33 }
  0xa0   : > { %811 = vmatprep.mubr.bf16.mxu0 %v3437_v34 }
  0xa7   : > { %812 = vmatmul.mubr.bf16.gmra.mrb[36].mxu0 %v3442_v35 }
  0xa8   : > { %819 = vmatprep.mubr.bf16.mxu0 %v3445_v36 }
  0xaf   : > { %820 = vmatmul.mubr.bf16.gmra.mrb[40].mxu0 %v3450_v37 }
  0xb0   : > { %827 = vmatprep.mubr.bf16.mxu0 %v3453_v38 }
  0xb7   : > { %828 = vmatmul.mubr.bf16.gmra.mrb[44].mxu0 %v3458_v39 }
  0xb8   : > { %835 = vmatprep.mubr.bf16.mxu0 %v3461_v40 }
  0xbf   : > { %836 = vmatmul.mubr.bf16.gmra.mrb[48].mxu0 %v3469_v42 }
  0xc0   : > { %843 = vmatprep.mubr.bf16.mxu0 %v3472_v43 }
  0xc7   : > { %844 = vmatmul.mubr.bf16.gmra.mrb[52].mxu0 %v3480_v45 }
  0xc8   : > { %851 = vmatprep.mubr.bf16.mxu0 %v3483_v46 }
  0xcf   : > { %852 = vmatmul.mubr.bf16.gmra.mrb[56].mxu0 %v3488_v47 }
  0xd0   : > { %859 = vmatprep.mubr.bf16.mxu0 %v3491_v48 }
  0xd7   : > { %860 = vmatmul.mubr.bf16.gmra.mrb[60].mxu0 %v3496_v49 }
 0x132   : > { %v2485_v50 = vpop.f32.mrb[0].mxu0 }
 0x133   : > { %v2486_v51 = vpop.f32.mrb[1].mxu0 }
 0x134   : > { %v2487_v52 = vadd.f32 %v2486_v51, %v2485_v50  ;;  %v2488_v53 = vpop.f32.mrb[2].mxu0 }
 0x135   : > { %v2489_v54 = vpop.f32.mrb[3].mxu0 }
 0x136   : > { %v2490_v55 = vadd.f32 %v2489_v54, %v2488_v53 }
 0x138   : > { %v868_v56 = vpack.c.bf16 %v2490_v55, %v2487_v52 }
 0x13a   : > { %v2491_v57 = vpop.f32.mrb[4].mxu0  ;;  %2801 = vmatprep.mubr.msk.bf16.mxu1 %vm902_vm0, %v868_v56 }
 0x13b   : > { %v2492_v58 = vpop.f32.mrb[5].mxu0 }
 0x13c   : > { %v2493_v59 = vadd.f32 %v2492_v58, %v2491_v57  ;;  %v2494_v60 = vpop.f32.mrb[6].mxu0 }
 0x13d   : > { %v2495_v61 = vpop.f32.mrb[7].mxu0 }
 0x13e   : > { %v2496_v62 = vadd.f32 %v2495_v61, %v2494_v60 }
 0x140   : > { %v869_v63 = vpack.c.bf16 %v2496_v62, %v2493_v59 }
 0x142   : > { %v2497_v0 = vpop.f32.mrb[8].mxu0  ;;  %2802 = vmatmul.mubr.msk.bf16.vlgmr.msra.gmra.mrb[0].mxu1 %vm902_vm0, %v869_v63 }
 0x143   : > { %v2498_v1 = vpop.f32.mrb[9].mxu0 }
 0x144   : > { %v2499_v2 = vadd.f32 %v2498_v1, %v2497_v0  ;;  %v2500_v3 = vpop.f32.mrb[10].mxu0 }
 0x145   : > { %v2501_v4 = vpop.f32.mrb[11].mxu0 }
 0x146   : > { %v2502_v5 = vadd.f32 %v2501_v4, %v2500_v3 }
 0x148   : > { %v870_v6 = vpack.c.bf16 %v2502_v5, %v2499_v2 }
 0x14a   : > { %v2503_v7 = vpop.f32.mrb[12].mxu0  ;;  %2805 = vmatprep.mubr.msk.bf16.mxu1 %vm902_vm0, %v870_v6 }
 0x14b   : > { %v2504_v8 = vpop.f32.mrb[13].mxu0 }
 0x14c   : > { %v2505_v9 = vadd.f32 %v2504_v8, %v2503_v7  ;;  %v2506_v10 = vpop.f32.mrb[14].mxu0 }
 0x14d   : > { %v2507_v12 = vpop.f32.mrb[15].mxu0 }
 0x14e   : > { %v2508_v13 = vadd.f32 %v2507_v12, %v2506_v10 }
 0x150   : > { %v871_v14 = vpack.c.bf16 %v2508_v13, %v2505_v9 }
 0x152   : > { %v2509_v15 = vpop.f32.mrb[16].mxu0  ;;  %2806 = vmatmul.mubr.msk.bf16.gmra.mrb[4].mxu1 %vm902_vm0, %v871_v14 }
 0x153   : > { %v2510_v16 = vpop.f32.mrb[17].mxu0 }
 0x154   : > { %v2511_v41 = vadd.f32 %v2510_v16, %v2509_v15  ;;  %v2512_v44 = vpop.f32.mrb[18].mxu0 }
 0x155   : > { %v2513_v50 = vpop.f32.mrb[19].mxu0 }
 0x156   : > { %v2514_v51 = vadd.f32 %v2513_v50, %v2512_v44 }
 0x158   : > { %v872_v52 = vpack.c.bf16 %v2514_v51, %v2511_v41 }
 0x15a   : > { %v2515_v53 = vpop.f32.mrb[20].mxu0  ;;  %2809 = vmatprep.mubr.msk.bf16.mxu1 %vm902_vm0, %v872_v52 }
 0x15b   : > { %v2516_v54 = vpop.f32.mrb[21].mxu0 }
 0x15c   : > { %v2517_v55 = vadd.f32 %v2516_v54, %v2515_v53  ;;  %v2518_v56 = vpop.f32.mrb[22].mxu0 }
 0x15d   : > { %v2519_v57 = vpop.f32.mrb[23].mxu0 }
 0x15e   : > { %v2520_v58 = vadd.f32 %v2519_v57, %v2518_v56 }
 0x160   : > { %v873_v59 = vpack.c.bf16 %v2520_v58, %v2517_v55 }
 0x162   : > { %v2521_v60 = vpop.f32.mrb[24].mxu0  ;;  %2810 = vmatmul.mubr.msk.bf16.gmra.mrb[8].mxu1 %vm902_vm0, %v873_v59 }
 0x163   : > { %v2522_v61 = vpop.f32.mrb[25].mxu0 }
 0x164   : > { %v2523_v62 = vadd.f32 %v2522_v61, %v2521_v60  ;;  %v2524_v63 = vpop.f32.mrb[26].mxu0 }
 0x165   : > { %v2525_v0 = vpop.f32.mrb[27].mxu0 }
 0x166   : > { %v2526_v1 = vadd.f32 %v2525_v0, %v2524_v63 }
 0x168   : > { %v874_v2 = vpack.c.bf16 %v2526_v1, %v2523_v62 }
 0x16a   : > { %v2527_v3 = vpop.f32.mrb[28].mxu0  ;;  %2813 = vmatprep.mubr.msk.bf16.mxu1 %vm902_vm0, %v874_v2 }
 0x16b   : > { %v2528_v4 = vpop.f32.mrb[29].mxu0 }
 0x16c   : > { %v2529_v5 = vadd.f32 %v2528_v4, %v2527_v3  ;;  %v2530_v6 = vpop.f32.mrb[30].mxu0 }
 0x16d   : > { %v2531_v7 = vpop.f32.mrb[31].mxu0 }
 0x16e   : > { %v2532_v8 = vadd.f32 %v2531_v7, %v2530_v6 }
 0x170   : > { %v875_v9 = vpack.c.bf16 %v2532_v8, %v2529_v5 }
 0x172   : > { %v2533_v10 = vpop.f32.mrb[32].mxu0  ;;  %2814 = vmatmul.mubr.msk.bf16.gmra.mrb[12].mxu1 %vm902_vm0, %v875_v9 }
 0x173   : > { %v2534_v12 = vpop.f32.mrb[33].mxu0 }
 0x174   : > { %v2535_v13 = vadd.f32 %v2534_v12, %v2533_v10  ;;  %v2536_v14 = vpop.f32.mrb[34].mxu0 }
 0x175   : > { %v2537_v15 = vpop.f32.mrb[35].mxu0 }
 0x176   : > { %v2538_v16 = vadd.f32 %v2537_v15, %v2536_v14 }
 0x178   : > { %v876_v41 = vpack.c.bf16 %v2538_v16, %v2535_v13  ;;  %v3514_v13 = vld [vmem:[%s3832_s4] sm:$0xff]   ;;  %v3523_v16 = vld [vmem:[%s3832_s4 + $0x8] sm:$0xff]  }
 0x179   : > { %2833 = vmatprep.subr.bf16.mxu1 %v3514_v13  ;;  %2905 = vmatprep.subr.bf16.mxu0 %v3514_v13 }
 0x17a   : > { %v2539_v44 = vpop.f32.mrb[36].mxu0  ;;  %2817 = vmatprep.mubr.msk.bf16.mxu1 %vm902_vm0, %v876_v41  ;;  %2834 = vmatpush3.bf16.msra.mxu1 %v3514_v13 }
 0x17b   : > { %v2540_v50 = vpop.f32.mrb[37].mxu0  ;;  %2835 = vmatprep.subr.bf16.mxu1 %v3523_v16 }
 0x17c   : > { %v2541_v51 = vadd.f32 %v2540_v50, %v2539_v44  ;;  %v2542_v52 = vpop.f32.mrb[38].mxu0 }
 0x17d   : > { %v2543_v53 = vpop.f32.mrb[39].mxu0 }
 0x17e   : > { %v2544_v54 = vadd.f32 %v2543_v53, %v2542_v52  ;;  %2836 = vmatpush3.bf16.msra.mxu1 %v3523_v16 }
 0x180   : > { %v877_v55 = vpack.c.bf16 %v2544_v54, %v2541_v51 }
 0x182   : > { %v2545_v56 = vpop.f32.mrb[40].mxu0  ;;  %2818 = vmatmul.mubr.msk.bf16.gmra.mrb[16].mxu1 %vm902_vm0, %v877_v55 }
 0x183   : > { %v2546_v57 = vpop.f32.mrb[41].mxu0 }
 0x184   : > { %v2547_v58 = vadd.f32 %v2546_v57, %v2545_v56  ;;  %v2548_v59 = vpop.f32.mrb[42].mxu0 }
 0x185   : > { %v2549_v60 = vpop.f32.mrb[43].mxu0 }
 0x186   : > { %v2550_v61 = vadd.f32 %v2549_v60, %v2548_v59 }
 0x188   : > { %v878_v62 = vpack.c.bf16 %v2550_v61, %v2547_v58 }
 0x18a   : > { %v2551_v63 = vpop.f32.mrb[44].mxu0  ;;  %2821 = vmatprep.mubr.msk.bf16.mxu1 %vm902_vm0, %v878_v62 }
 0x18b   : > { %v2552_v0 = vpop.f32.mrb[45].mxu0 }
 0x18c   : > { %v2553_v1 = vadd.f32 %v2552_v0, %v2551_v63  ;;  %v2554_v2 = vpop.f32.mrb[46].mxu0 }
 0x18d   : > { %v2555_v3 = vpop.f32.mrb[47].mxu0 }
 0x18e   : > { %v2556_v4 = vadd.f32 %v2555_v3, %v2554_v2 }
 0x190   : > { %v879_v5 = vpack.c.bf16 %v2556_v4, %v2553_v1  ;;  %v3533_v4 = vld [vmem:[%s3831_s3] ss:$0 sm:$0xff] }
 0x192   : > { %v2557_v6 = vpop.f32.mrb[48].mxu0  ;;  %2822 = vmatmul.mubr.msk.bf16.gmra.mrb[20].mxu1 %vm902_vm0, %v879_v5 }
 0x193   : > { %v2558_v7 = vpop.f32.mrb[49].mxu0 }
 0x194   : > { %v2559_v8 = vadd.f32 %v2558_v7, %v2557_v6  ;;  %v2560_v9 = vpop.f32.mrb[50].mxu0 }
 0x195   : > { %v2561_v10 = vpop.f32.mrb[51].mxu0 }
 0x196   : > { %v2562_v12 = vadd.f32 %v2561_v10, %v2560_v9 }
 0x198   : > { %v880_v14 = vpack.c.bf16 %v2562_v12, %v2559_v8 }
 0x19a   : > { %v2563_v15 = vpop.f32.mrb[52].mxu0  ;;  %2825 = vmatprep.mubr.msk.bf16.mxu1 %vm902_vm0, %v880_v14 }
 0x19b   : > { %v2564_v41 = vpop.f32.mrb[53].mxu0 }
 0x19c   : > { %v2565_v44 = vadd.f32 %v2564_v41, %v2563_v15  ;;  %v2566_v50 = vpop.f32.mrb[54].mxu0 }
 0x19d   : > { %v2567_v51 = vpop.f32.mrb[55].mxu0 }
 0x19e   : > { %v2568_v52 = vadd.f32 %v2567_v51, %v2566_v50 }
 0x1a0   : > { %v881_v53 = vpack.c.bf16 %v2568_v52, %v2565_v44 }
 0x1a2   : > { %v2569_v54 = vpop.f32.mrb[56].mxu0  ;;  %2826 = vmatmul.mubr.msk.bf16.gmra.mrb[24].mxu1 %vm902_vm0, %v881_v53 }
 0x1a3   : > { %v2570_v55 = vpop.f32.mrb[57].mxu0 }
 0x1a4   : > { %v2571_v56 = vadd.f32 %v2570_v55, %v2569_v54  ;;  %v2572_v57 = vpop.f32.mrb[58].mxu0 }
 0x1a5   : > { %v2573_v58 = vpop.f32.mrb[59].mxu0 }
 0x1a6   : > { %v2574_v59 = vadd.f32 %v2573_v58, %v2572_v57 }
 0x1a8   : > { %v882_v60 = vpack.c.bf16 %v2574_v59, %v2571_v56 }
 0x1aa   : > { %v2575_v61 = vpop.f32.mrb[60].mxu0  ;;  %2829 = vmatprep.mubr.msk.bf16.mxu1 %vm902_vm0, %v882_v60 }
 0x1ab   : > { %v2576_v62 = vpop.f32.mrb[61].mxu0 }
 0x1ac   : > { %v2577_v63 = vadd.f32 %v2576_v62, %v2575_v61  ;;  %v2578_v0 = vpop.f32.mrb[62].mxu0 }
 0x1ad   : > { %v2579_v1 = vpop.f32.mrb[63].mxu0 }
 0x1ae   : > { %v2580_v2 = vadd.f32 %v2579_v1, %v2578_v0 }
 0x1b0   : > { %v883_v3 = vpack.c.bf16 %v2580_v2, %v2577_v63 }
 0x1b2   : > { %2830 = vmatmul.mubr.msk.bf16.gmra.mrb[28].mxu1 %vm902_vm0, %v883_v3 }
 0x215   : > { %v2803_v5 = vpop.f32.mrb[0].mxu1 }
 0x216   : > { %v994_v6 = vadd.f32 %v2803_v5, %v3533_v4  ;;  %v985_v7 = vpop.f32.mrb[1].mxu1 }
 0x217   : > { %v986_v8 = vadd.f32 %v3533_v4, %v985_v7  ;;  %v2804_v9 = vpop.f32.mrb[2].mxu1 }
 0x218   : > { %v997_v10 = vadd.f32 %v2804_v9, %v3533_v4  ;;  %v988_v12 = vpop.f32.mrb[3].mxu1  ;;  %v1114_v15 = vmax.f32 %v994_v6, 0.0 }
 0x219   : > { %v989_v14 = vadd.f32 %v3533_v4, %v988_v12  ;;  %v1112_v44 = vmax.f32 %v986_v8, 0.0 }
 0x21a   : > { %v1115_v41 = vmax.f32 %v997_v10, 0.0 }
 0x21b   : > { %v1113_v50 = vmax.f32 %v989_v14, 0.0 }
 0x21c   : > { %v1145_v51 = vpack.c.bf16 %v1115_v41, %v1114_v15 }
 0x21d   : > { %v1144_v52 = vpack.c.bf16 %v1113_v50, %v1112_v44 }
 0x21f   : > { %2837 = vmatprep.mubr.msk.bf16.mxu1 %vm902_vm0, %v1144_v52 }
 0x220   : > { %2838 = vmatmul.mubr.msk.bf16.vlgmr.msra.gmra.mrb[32].mxu1 %vm902_vm0, %v1145_v51 }
 0x225   : > { %v2807_v53 = vpop.f32.mrb[4].mxu1 }
 0x226   : > { %v1010_v54 = vadd.f32 %v2807_v53, %v3533_v4  ;;  %v1001_v55 = vpop.f32.mrb[5].mxu1 }
 0x227   : > { %v1002_v56 = vadd.f32 %v3533_v4, %v1001_v55  ;;  %v2808_v57 = vpop.f32.mrb[6].mxu1 }
 0x228   : > { %v1013_v58 = vadd.f32 %v2808_v57, %v3533_v4  ;;  %v1004_v59 = vpop.f32.mrb[7].mxu1  ;;  %v1118_v61 = vmax.f32 %v1010_v54, 0.0 }
 0x229   : > { %v1005_v60 = vadd.f32 %v3533_v4, %v1004_v59  ;;  %v1116_v63 = vmax.f32 %v1002_v56, 0.0 }
 0x22a   : > { %v1119_v62 = vmax.f32 %v1013_v58, 0.0 }
 0x22b   : > { %v1117_v0 = vmax.f32 %v1005_v60, 0.0 }
 0x22c   : > { %v1147_v1 = vpack.c.bf16 %v1119_v62, %v1118_v61 }
 0x22d   : > { %v1146_v2 = vpack.c.bf16 %v1117_v0, %v1116_v63 }
 0x22f   : > { %2841 = vmatprep.mubr.msk.bf16.mxu1 %vm902_vm0, %v1146_v2 }
 0x230   : > { %2842 = vmatmul.mubr.msk.bf16.gmra.mrb[36].mxu1 %vm902_vm0, %v1147_v1 }
 0x235   : > { %v2811_v3 = vpop.f32.mrb[8].mxu1 }
 0x236   : > { %v1026_v5 = vadd.f32 %v2811_v3, %v3533_v4  ;;  %v1017_v6 = vpop.f32.mrb[9].mxu1 }
 0x237   : > { %v1018_v7 = vadd.f32 %v3533_v4, %v1017_v6  ;;  %v2812_v8 = vpop.f32.mrb[10].mxu1 }
 0x238   : > { %v1029_v9 = vadd.f32 %v2812_v8, %v3533_v4  ;;  %v1020_v10 = vpop.f32.mrb[11].mxu1  ;;  %v1122_v14 = vmax.f32 %v1026_v5, 0.0 }
 0x239   : > { %v1021_v12 = vadd.f32 %v3533_v4, %v1020_v10  ;;  %v1120_v41 = vmax.f32 %v1018_v7, 0.0 }
 0x23a   : > { %v1123_v15 = vmax.f32 %v1029_v9, 0.0 }
 0x23b   : > { %v1121_v44 = vmax.f32 %v1021_v12, 0.0 }
 0x23c   : > { %v1149_v50 = vpack.c.bf16 %v1123_v15, %v1122_v14 }
 0x23d   : > { %v1148_v51 = vpack.c.bf16 %v1121_v44, %v1120_v41 }
 0x23f   : > { %2845 = vmatprep.mubr.msk.bf16.mxu1 %vm902_vm0, %v1148_v51 }
 0x240   : > { %2846 = vmatmul.mubr.msk.bf16.gmra.mrb[40].mxu1 %vm902_vm0, %v1149_v50 }
 0x245   : > { %v2815_v52 = vpop.f32.mrb[12].mxu1 }
 0x246   : > { %v1042_v53 = vadd.f32 %v2815_v52, %v3533_v4  ;;  %v1033_v54 = vpop.f32.mrb[13].mxu1 }
 0x247   : > { %v1034_v55 = vadd.f32 %v3533_v4, %v1033_v54  ;;  %v2816_v56 = vpop.f32.mrb[14].mxu1 }
 0x248   : > { %v1045_v57 = vadd.f32 %v2816_v56, %v3533_v4  ;;  %v1036_v58 = vpop.f32.mrb[15].mxu1  ;;  %v1126_v60 = vmax.f32 %v1042_v53, 0.0 }
 0x249   : > { %v1037_v59 = vadd.f32 %v3533_v4, %v1036_v58  ;;  %v1124_v62 = vmax.f32 %v1034_v55, 0.0 }
 0x24a   : > { %v1127_v61 = vmax.f32 %v1045_v57, 0.0 }
 0x24b   : > { %v1125_v63 = vmax.f32 %v1037_v59, 0.0 }
 0x24c   : > { %v1151_v0 = vpack.c.bf16 %v1127_v61, %v1126_v60 }
 0x24d   : > { %v1150_v1 = vpack.c.bf16 %v1125_v63, %v1124_v62 }
 0x24f   : > { %2849 = vmatprep.mubr.msk.bf16.mxu1 %vm902_vm0, %v1150_v1 }
 0x250   : > { %2850 = vmatmul.mubr.msk.bf16.gmra.mrb[44].mxu1 %vm902_vm0, %v1151_v0 }
 0x255   : > { %v2819_v2 = vpop.f32.mrb[16].mxu1 }
 0x256   : > { %v1058_v3 = vadd.f32 %v2819_v2, %v3533_v4  ;;  %v1049_v5 = vpop.f32.mrb[17].mxu1 }
 0x257   : > { %v1050_v6 = vadd.f32 %v3533_v4, %v1049_v5  ;;  %v2820_v7 = vpop.f32.mrb[18].mxu1 }
 0x258   : > { %v1061_v8 = vadd.f32 %v2820_v7, %v3533_v4  ;;  %v1052_v9 = vpop.f32.mrb[19].mxu1  ;;  %v1130_v12 = vmax.f32 %v1058_v3, 0.0 }
 0x259   : > { %v1053_v10 = vadd.f32 %v3533_v4, %v1052_v9  ;;  %v1128_v15 = vmax.f32 %v1050_v6, 0.0 }
 0x25a   : > { %v1131_v14 = vmax.f32 %v1061_v8, 0.0 }
 0x25b   : > { %v1129_v41 = vmax.f32 %v1053_v10, 0.0 }
 0x25c   : > { %v1153_v44 = vpack.c.bf16 %v1131_v14, %v1130_v12 }
 0x25d   : > { %v1152_v50 = vpack.c.bf16 %v1129_v41, %v1128_v15 }
 0x25f   : > { %2853 = vmatprep.mubr.msk.bf16.mxu1 %vm902_vm0, %v1152_v50 }
 0x260   : > { %2854 = vmatmul.mubr.msk.bf16.gmra.mrb[48].mxu1 %vm902_vm0, %v1153_v44 }
 0x265   : > { %v2823_v51 = vpop.f32.mrb[20].mxu1 }
 0x266   : > { %v1074_v52 = vadd.f32 %v2823_v51, %v3533_v4  ;;  %v1065_v53 = vpop.f32.mrb[21].mxu1 }
 0x267   : > { %v1066_v54 = vadd.f32 %v3533_v4, %v1065_v53  ;;  %v2824_v55 = vpop.f32.mrb[22].mxu1 }
 0x268   : > { %v1077_v56 = vadd.f32 %v2824_v55, %v3533_v4  ;;  %v1068_v57 = vpop.f32.mrb[23].mxu1  ;;  %v1134_v59 = vmax.f32 %v1074_v52, 0.0 }
 0x269   : > { %v1069_v58 = vadd.f32 %v3533_v4, %v1068_v57  ;;  %v1132_v61 = vmax.f32 %v1066_v54, 0.0 }
 0x26a   : > { %v1135_v60 = vmax.f32 %v1077_v56, 0.0 }
 0x26b   : > { %v1133_v62 = vmax.f32 %v1069_v58, 0.0 }
 0x26c   : > { %v1155_v63 = vpack.c.bf16 %v1135_v60, %v1134_v59 }
 0x26d   : > { %v1154_v0 = vpack.c.bf16 %v1133_v62, %v1132_v61 }
 0x26f   : > { %2857 = vmatprep.mubr.msk.bf16.mxu1 %vm902_vm0, %v1154_v0 }
 0x270   : > { %2858 = vmatmul.mubr.msk.bf16.gmra.mrb[52].mxu1 %vm902_vm0, %v1155_v63 }
 0x275   : > { %v2827_v1 = vpop.f32.mrb[24].mxu1 }
 0x276   : > { %v1090_v2 = vadd.f32 %v2827_v1, %v3533_v4  ;;  %v1081_v3 = vpop.f32.mrb[25].mxu1  ;;  %v3587_v1 = vld [vmem:[%s3833_s5] ss:$0 sm:$0xff] }
 0x277   : > { %v1082_v5 = vadd.f32 %v3533_v4, %v1081_v3  ;;  %v2828_v6 = vpop.f32.mrb[26].mxu1 }
 0x278   : > { %v1093_v7 = vadd.f32 %v2828_v6, %v3533_v4  ;;  %v1084_v8 = vpop.f32.mrb[27].mxu1  ;;  %v1138_v10 = vmax.f32 %v1090_v2, 0.0 }
 0x279   : > { %v1085_v9 = vadd.f32 %v3533_v4, %v1084_v8  ;;  %v1136_v14 = vmax.f32 %v1082_v5, 0.0 }
 0x27a   : > { %v1139_v12 = vmax.f32 %v1093_v7, 0.0 }
 0x27b   : > { %v1137_v15 = vmax.f32 %v1085_v9, 0.0 }
 0x27c   : > { %v1157_v41 = vpack.c.bf16 %v1139_v12, %v1138_v10 }
 0x27d   : > { %v1156_v44 = vpack.c.bf16 %v1137_v15, %v1136_v14 }
 0x27f   : > { %2861 = vmatprep.mubr.msk.bf16.mxu1 %vm902_vm0, %v1156_v44 }
 0x280   : > { %2862 = vmatmul.mubr.msk.bf16.gmra.mrb[56].mxu1 %vm902_vm0, %v1157_v41 }
 0x285   : > { %v2831_v50 = vpop.f32.mrb[28].mxu1 }
 0x286   : > { %v1106_v51 = vadd.f32 %v2831_v50, %v3533_v4  ;;  %v1097_v52 = vpop.f32.mrb[29].mxu1 }
 0x287   : > { %v1098_v53 = vadd.f32 %v3533_v4, %v1097_v52  ;;  %v2832_v54 = vpop.f32.mrb[30].mxu1 }
 0x288   : > { %v1109_v55 = vadd.f32 %v2832_v54, %v3533_v4  ;;  %v1100_v56 = vpop.f32.mrb[31].mxu1  ;;  %v1142_v58 = vmax.f32 %v1106_v51, 0.0 }
 0x289   : > { %v1101_v57 = vadd.f32 %v3533_v4, %v1100_v56  ;;  %v1140_v60 = vmax.f32 %v1098_v53, 0.0 }
 0x28a   : > { %v1143_v59 = vmax.f32 %v1109_v55, 0.0 }
 0x28b   : > { %v1141_v61 = vmax.f32 %v1101_v57, 0.0 }
 0x28c   : > { %v1159_v62 = vpack.c.bf16 %v1143_v59, %v1142_v58 }
 0x28d   : > { %v1158_v63 = vpack.c.bf16 %v1141_v61, %v1140_v60 }
 0x28f   : > { %2865 = vmatprep.mubr.msk.bf16.mxu1 %vm902_vm0, %v1158_v63 }
 0x290   : > { %2866 = vmatmul.mubr.msk.bf16.gmra.mrb[60].mxu1 %vm902_vm0, %v1159_v62 }
 0x291   : > { %1435 = vmatprep.mubr.bf16.mxu1 %v3361_v11 }
 0x2f3   : > { %v2839_v0 = vpop.f32.mrb[32].mxu1 }
 0x2f4   : > { %v1260_v2 = vpop.f32.mrb[33].mxu1  ;;  %v1269_v5 = vadd.f32 %v2839_v0, %v3587_v1 }
 0x2f5   : > { %v2840_v3 = vpop.f32.mrb[34].mxu1  ;;  %v1261_v8 = vadd.f32 %v3587_v1, %v1260_v2 }
 0x2f6   : > { %v1272_v6 = vadd.f32 %v2840_v3, %v3587_v1  ;;  %v1263_v7 = vpop.f32.mrb[35].mxu1 }
 0x2f7   : > { %v1264_v9 = vadd.f32 %v3587_v1, %v1263_v7 }
 0x2f8   : > { %v1388_v10 = vpack.c.bf16 %v1272_v6, %v1269_v5 }
 0x2f9   : > { %v1387_v12 = vpack.c.bf16 %v1264_v9, %v1261_v8 }
 0x303   : > { %v2843_v11 = vpop.f32.mrb[36].mxu1 }
 0x304   : > { %v1276_v14 = vpop.f32.mrb[37].mxu1  ;;  %v1285_v41 = vadd.f32 %v2843_v11, %v3587_v1 }
 0x305   : > { %v2844_v15 = vpop.f32.mrb[38].mxu1  ;;  %v1277_v51 = vadd.f32 %v3587_v1, %v1276_v14 }
 0x306   : > { %v1288_v44 = vadd.f32 %v2844_v15, %v3587_v1  ;;  %v1279_v50 = vpop.f32.mrb[39].mxu1 }
 0x307   : > { %v1280_v52 = vadd.f32 %v3587_v1, %v1279_v50 }
 0x308   : > { %v1390_v53 = vpack.c.bf16 %v1288_v44, %v1285_v41 }
 0x309   : > { %v1389_v54 = vpack.c.bf16 %v1280_v52, %v1277_v51 }
 0x313   : > { %v2847_v55 = vpop.f32.mrb[40].mxu1 }
 0x314   : > { %v1292_v56 = vpop.f32.mrb[41].mxu1  ;;  %v1301_v58 = vadd.f32 %v2847_v55, %v3587_v1 }
 0x315   : > { %v2848_v57 = vpop.f32.mrb[42].mxu1  ;;  %v1293_v61 = vadd.f32 %v3587_v1, %v1292_v56 }
 0x316   : > { %v1304_v59 = vadd.f32 %v2848_v57, %v3587_v1  ;;  %v1295_v60 = vpop.f32.mrb[43].mxu1 }
 0x317   : > { %v1296_v62 = vadd.f32 %v3587_v1, %v1295_v60 }
 0x318   : > { %v1392_v63 = vpack.c.bf16 %v1304_v59, %v1301_v58 }
 0x319   : > { %v1391_v0 = vpack.c.bf16 %v1296_v62, %v1293_v61 }
 0x323   : > { %v2851_v2 = vpop.f32.mrb[44].mxu1 }
 0x324   : > { %v1308_v3 = vpop.f32.mrb[45].mxu1  ;;  %v1317_v6 = vadd.f32 %v2851_v2, %v3587_v1 }
 0x325   : > { %v2852_v5 = vpop.f32.mrb[46].mxu1  ;;  %v1309_v9 = vadd.f32 %v3587_v1, %v1308_v3 }
 0x326   : > { %v1320_v7 = vadd.f32 %v2852_v5, %v3587_v1  ;;  %v1311_v8 = vpop.f32.mrb[47].mxu1 }
 0x327   : > { %v1312_v11 = vadd.f32 %v3587_v1, %v1311_v8 }
 0x328   : > { %v1394_v14 = vpack.c.bf16 %v1320_v7, %v1317_v6 }
 0x329   : > { %v1393_v15 = vpack.c.bf16 %v1312_v11, %v1309_v9 }
 0x333   : > { %v2855_v41 = vpop.f32.mrb[48].mxu1 }
 0x334   : > { %v1324_v44 = vpop.f32.mrb[49].mxu1  ;;  %v1333_v51 = vadd.f32 %v2855_v41, %v3587_v1 }
 0x335   : > { %v2856_v50 = vpop.f32.mrb[50].mxu1  ;;  %v1325_v56 = vadd.f32 %v3587_v1, %v1324_v44 }
 0x336   : > { %v1336_v52 = vadd.f32 %v2856_v50, %v3587_v1  ;;  %v1327_v55 = vpop.f32.mrb[51].mxu1 }
 0x337   : > { %v1328_v57 = vadd.f32 %v3587_v1, %v1327_v55 }
 0x338   : > { %v1396_v58 = vpack.c.bf16 %v1336_v52, %v1333_v51 }
 0x339   : > { %v1395_v59 = vpack.c.bf16 %v1328_v57, %v1325_v56 }
 0x33b   : > { %2617 = vmatprep.subr.bf16.mxu1 %v1395_v59 }
 0x33c   : > { %2618 = vmatpush3.bf16.msra.mxu1 %v1387_v12 }
 0x33d   : > { %2619 = vmatprep.subr.bf16.mxu1 %v1396_v58 }
 0x340   : > { %2620 = vmatpush3.bf16.msra.mxu1 %v1388_v10 }
 0x343   : > { %v2859_v60 = vpop.f32.mrb[52].mxu1 }
 0x344   : > { %v1340_v61 = vpop.f32.mrb[53].mxu1  ;;  %v1349_v2 = vadd.f32 %v2859_v60, %v3587_v1 }
 0x345   : > { %v2860_v62 = vpop.f32.mrb[54].mxu1  ;;  %v1341_v6 = vadd.f32 %v3587_v1, %v1340_v61 }
 0x346   : > { %v1352_v3 = vadd.f32 %v2860_v62, %v3587_v1  ;;  %v1343_v5 = vpop.f32.mrb[55].mxu1 }
 0x347   : > { %v1344_v7 = vadd.f32 %v3587_v1, %v1343_v5 }
 0x348   : > { %v1398_v8 = vpack.c.bf16 %v1352_v3, %v1349_v2 }
 0x349   : > { %v1397_v9 = vpack.c.bf16 %v1344_v7, %v1341_v6 }
 0x34b   : > { %2621 = vmatprep.subr.bf16.mxu1 %v1397_v9 }
 0x34c   : > { %2622 = vmatpush3.bf16.msra.mxu1 %v1389_v54 }
 0x34d   : > { %2623 = vmatprep.subr.bf16.mxu1 %v1398_v8 }
 0x350   : > { %2624 = vmatpush3.bf16.msra.mxu1 %v1390_v53 }
 0x353   : > { %v2863_v12 = vpop.f32.mrb[56].mxu1 }
 0x354   : > { %v1356_v10 = vpop.f32.mrb[57].mxu1  ;;  %v1365_v41 = vadd.f32 %v2863_v12, %v3587_v1 }
 0x355   : > { %v2864_v11 = vpop.f32.mrb[58].mxu1  ;;  %v1357_v51 = vadd.f32 %v3587_v1, %v1356_v10 }
 0x356   : > { %v1368_v44 = vadd.f32 %v2864_v11, %v3587_v1  ;;  %v1359_v50 = vpop.f32.mrb[59].mxu1 }
 0x357   : > { %v1360_v52 = vadd.f32 %v3587_v1, %v1359_v50 }
 0x358   : > { %v1400_v55 = vpack.c.bf16 %v1368_v44, %v1365_v41 }
 0x359   : > { %v1399_v56 = vpack.c.bf16 %v1360_v52, %v1357_v51 }
 0x35b   : > { %2625 = vmatprep.subr.bf16.mxu1 %v1399_v56 }
 0x35c   : > { %2626 = vmatpush3.bf16.msra.mxu1 %v1391_v0 }
 0x35d   : > { %2627 = vmatprep.subr.bf16.mxu1 %v1400_v55 }
 0x360   : > { %2628 = vmatpush3.bf16.msra.mxu1 %v1392_v63 }
 0x363   : > { %v2867_v54 = vpop.f32.mrb[60].mxu1 }
 0x364   : > { %v1372_v53 = vpop.f32.mrb[61].mxu1  ;;  %v1381_v58 = vadd.f32 %v2867_v54, %v3587_v1 }
 0x365   : > { %v2868_v57 = vpop.f32.mrb[62].mxu1  ;;  %v1373_v61 = vadd.f32 %v3587_v1, %v1372_v53 }
 0x366   : > { %v1384_v59 = vadd.f32 %v2868_v57, %v3587_v1  ;;  %v1375_v60 = vpop.f32.mrb[63].mxu1 }
 0x367   : > { %v1376_v62 = vadd.f32 %v3587_v1, %v1375_v60 }
 0x368   : > { %v1402_v2 = vpack.c.bf16 %v1384_v59, %v1381_v58 }
 0x369   : > { %v1401_v3 = vpack.c.bf16 %v1376_v62, %v1373_v61 }
 0x36b   : > { %2629 = vmatprep.subr.bf16.mxu1 %v1401_v3 }
 0x36c   : > { %2630 = vmatpush3.bf16.msra.mxu1 %v1393_v15 }
 0x36d   : > { %2631 = vmatprep.subr.bf16.mxu1 %v1402_v2 }
 0x370   : > { %2632 = vmatpush3.bf16.msra.mxu1 %v1394_v14 }
 0x373   : > { %1436 = vmatmul.mubr.bf16.vlgmr.msra.gmra.mrb[64].mxu1 %v3370_v17 }
 0x374   : > { %1443 = vmatprep.mubr.bf16.mxu1 %v3373_v18 }
 0x37b   : > { %1444 = vmatmul.mubr.bf16.gmra.mrb[68].mxu1 %v3378_v19 }
 0x37c   : > { %1451 = vmatprep.mubr.bf16.mxu1 %v3381_v20 }
 0x383   : > { %1452 = vmatmul.mubr.bf16.gmra.mrb[72].mxu1 %v3386_v21 }
 0x384   : > { %1459 = vmatprep.mubr.bf16.mxu1 %v3389_v22 }
 0x38b   : > { %1460 = vmatmul.mubr.bf16.gmra.mrb[76].mxu1 %v3394_v23 }
 0x38c   : > { %1467 = vmatprep.mubr.bf16.mxu1 %v3397_v24 }
 0x393   : > { %1468 = vmatmul.mubr.bf16.gmra.mrb[80].mxu1 %v3402_v25 }
 0x394   : > { %1475 = vmatprep.mubr.bf16.mxu1 %v3405_v26 }
 0x39b   : > { %1476 = vmatmul.mubr.bf16.gmra.mrb[84].mxu1 %v3410_v27 }
 0x39c   : > { %1483 = vmatprep.mubr.bf16.mxu1 %v3413_v28 }
 0x3a3   : > { %1484 = vmatmul.mubr.bf16.gmra.mrb[88].mxu1 %v3418_v29 }
 0x3a4   : > { %1491 = vmatprep.mubr.bf16.mxu1 %v3421_v30 }
 0x3ab   : > { %1492 = vmatmul.mubr.bf16.gmra.mrb[92].mxu1 %v3426_v31 }
 0x3ac   : > { %1499 = vmatprep.mubr.bf16.mxu1 %v3429_v32 }
 0x3b3   : > { %1500 = vmatmul.mubr.bf16.gmra.mrb[96].mxu1 %v3434_v33 }
 0x3b4   : > { %1507 = vmatprep.mubr.bf16.mxu1 %v3437_v34 }
 0x3bb   : > { %1508 = vmatmul.mubr.bf16.gmra.mrb[100].mxu1 %v3442_v35 }
 0x3bc   : > { %1515 = vmatprep.mubr.bf16.mxu1 %v3445_v36 }
 0x3c3   : > { %1516 = vmatmul.mubr.bf16.gmra.mrb[104].mxu1 %v3450_v37 }
 0x3c4   : > { %1523 = vmatprep.mubr.bf16.mxu1 %v3453_v38 }
 0x3cb   : > { %1524 = vmatmul.mubr.bf16.gmra.mrb[108].mxu1 %v3458_v39 }
 0x3cc   : > { %1531 = vmatprep.mubr.bf16.mxu1 %v3461_v40 }
 0x3d3   : > { %1532 = vmatmul.mubr.bf16.gmra.mrb[112].mxu1 %v3469_v42 }
 0x3d4   : > { %1539 = vmatprep.mubr.bf16.mxu1 %v3472_v43 }
 0x3db   : > { %1540 = vmatmul.mubr.bf16.gmra.mrb[116].mxu1 %v3480_v45 }
 0x3dc   : > { %1547 = vmatprep.mubr.bf16.mxu1 %v3483_v46 }
 0x3e3   : > { %1548 = vmatmul.mubr.bf16.gmra.mrb[120].mxu1 %v3488_v47 }
 0x3e4   : > { %1555 = vmatprep.mubr.bf16.mxu1 %v3491_v48 }
 0x3eb   : > { %1556 = vmatmul.mubr.bf16.gmra.mrb[124].mxu1 %v3496_v49 }
 0x446   : > { %v2633_v17 = vpop.f32.mrb[64].mxu1 }
 0x447   : > { %v2634_v18 = vpop.f32.mrb[65].mxu1 }
 0x448   : > { %v2635_v19 = vadd.f32 %v2634_v18, %v2633_v17  ;;  %v2636_v20 = vpop.f32.mrb[66].mxu1 }
 0x449   : > { %v2637_v21 = vpop.f32.mrb[67].mxu1 }
 0x44a   : > { %v2638_v22 = vadd.f32 %v2637_v21, %v2636_v20 }
 0x44c   : > { %v1564_v23 = vpack.c.bf16 %v2638_v22, %v2635_v19 }
 0x44e   : > { %v2639_v24 = vpop.f32.mrb[68].mxu1  ;;  %2873 = vmatprep.mubr.msk.bf16.mxu0 %vm902_vm0, %v1564_v23 }
 0x44f   : > { %v2640_v25 = vpop.f32.mrb[69].mxu1 }
 0x450   : > { %v2641_v26 = vadd.f32 %v2640_v25, %v2639_v24  ;;  %v2642_v27 = vpop.f32.mrb[70].mxu1 }
 0x451   : > { %v2643_v28 = vpop.f32.mrb[71].mxu1 }
 0x452   : > { %v2644_v29 = vadd.f32 %v2643_v28, %v2642_v27 }
 0x454   : > { %v1565_v30 = vpack.c.bf16 %v2644_v29, %v2641_v26 }
 0x456   : > { %v2645_v31 = vpop.f32.mrb[72].mxu1  ;;  %2874 = vmatmul.mubr.msk.bf16.vlgmr.msra.gmra.mrb[64].mxu0 %vm902_vm0, %v1565_v30 }
 0x457   : > { %v2646_v32 = vpop.f32.mrb[73].mxu1  ;;  %2906 = vmatpush3.bf16.msra.mxu0 %v3514_v13 }
 0x458   : > { %v2647_v33 = vadd.f32 %v2646_v32, %v2645_v31  ;;  %v2648_v34 = vpop.f32.mrb[74].mxu1  ;;  %2907 = vmatprep.subr.bf16.mxu0 %v3523_v16 }
 0x459   : > { %v2649_v35 = vpop.f32.mrb[75].mxu1 }
 0x45a   : > { %v2650_v36 = vadd.f32 %v2649_v35, %v2648_v34 }
 0x45b   : > { %2908 = vmatpush3.bf16.msra.mxu0 %v3523_v16 }
 0x45c   : > { %v1566_v37 = vpack.c.bf16 %v2650_v36, %v2647_v33 }
 0x45e   : > { %v2651_v38 = vpop.f32.mrb[76].mxu1  ;;  %2877 = vmatprep.mubr.msk.bf16.mxu0 %vm902_vm0, %v1566_v37 }
 0x45f   : > { %v2652_v39 = vpop.f32.mrb[77].mxu1 }
 0x460   : > { %v2653_v40 = vadd.f32 %v2652_v39, %v2651_v38  ;;  %v2654_v42 = vpop.f32.mrb[78].mxu1 }
 0x461   : > { %v2655_v43 = vpop.f32.mrb[79].mxu1 }
 0x462   : > { %v2656_v45 = vadd.f32 %v2655_v43, %v2654_v42 }
 0x464   : > { %v1567_v46 = vpack.c.bf16 %v2656_v45, %v2653_v40 }
 0x466   : > { %v2657_v47 = vpop.f32.mrb[80].mxu1  ;;  %2878 = vmatmul.mubr.msk.bf16.gmra.mrb[68].mxu0 %vm902_vm0, %v1567_v46 }
 0x467   : > { %v2658_v48 = vpop.f32.mrb[81].mxu1 }
 0x468   : > { %v2659_v49 = vadd.f32 %v2658_v48, %v2657_v47  ;;  %v2660_v13 = vpop.f32.mrb[82].mxu1 }
 0x469   : > { %v2661_v63 = vpop.f32.mrb[83].mxu1 }
 0x46a   : > { %v2662_v0 = vadd.f32 %v2661_v63, %v2660_v13 }
 0x46c   : > { %v1568_v14 = vpack.c.bf16 %v2662_v0, %v2659_v49 }
 0x46e   : > { %v2663_v16 = vpop.f32.mrb[84].mxu1  ;;  %2881 = vmatprep.mubr.msk.bf16.mxu0 %vm902_vm0, %v1568_v14 }
 0x46f   : > { %v2664_v15 = vpop.f32.mrb[85].mxu1 }
 0x470   : > { %v2665_v5 = vadd.f32 %v2664_v15, %v2663_v16  ;;  %v2666_v6 = vpop.f32.mrb[86].mxu1 }
 0x471   : > { %v2667_v7 = vpop.f32.mrb[87].mxu1 }
 0x472   : > { %v2668_v8 = vadd.f32 %v2667_v7, %v2666_v6 }
 0x474   : > { %v1569_v9 = vpack.c.bf16 %v2668_v8, %v2665_v5 }
 0x476   : > { %v2669_v12 = vpop.f32.mrb[88].mxu1  ;;  %2882 = vmatmul.mubr.msk.bf16.gmra.mrb[72].mxu0 %vm902_vm0, %v1569_v9 }
 0x477   : > { %v2670_v10 = vpop.f32.mrb[89].mxu1 }
 0x478   : > { %v2671_v11 = vadd.f32 %v2670_v10, %v2669_v12  ;;  %v2672_v41 = vpop.f32.mrb[90].mxu1 }
 0x479   : > { %v2673_v44 = vpop.f32.mrb[91].mxu1 }
 0x47a   : > { %v2674_v50 = vadd.f32 %v2673_v44, %v2672_v41 }
 0x47c   : > { %v1570_v51 = vpack.c.bf16 %v2674_v50, %v2671_v11 }
 0x47e   : > { %v2675_v52 = vpop.f32.mrb[92].mxu1  ;;  %2885 = vmatprep.mubr.msk.bf16.mxu0 %vm902_vm0, %v1570_v51 }
 0x47f   : > { %v2676_v55 = vpop.f32.mrb[93].mxu1 }
 0x480   : > { %v2677_v56 = vadd.f32 %v2676_v55, %v2675_v52  ;;  %v2678_v54 = vpop.f32.mrb[94].mxu1 }
 0x481   : > { %v2679_v53 = vpop.f32.mrb[95].mxu1 }
 0x482   : > { %v2680_v57 = vadd.f32 %v2679_v53, %v2678_v54 }
 0x484   : > { %v1571_v58 = vpack.c.bf16 %v2680_v57, %v2677_v56 }
 0x486   : > { %v2681_v59 = vpop.f32.mrb[96].mxu1  ;;  %2886 = vmatmul.mubr.msk.bf16.gmra.mrb[76].mxu0 %vm902_vm0, %v1571_v58 }
 0x487   : > { %v2682_v60 = vpop.f32.mrb[97].mxu1 }
 0x488   : > { %v2683_v61 = vadd.f32 %v2682_v60, %v2681_v59  ;;  %v2684_v62 = vpop.f32.mrb[98].mxu1 }
 0x489   : > { %v2685_v2 = vpop.f32.mrb[99].mxu1 }
 0x48a   : > { %v2686_v3 = vadd.f32 %v2685_v2, %v2684_v62 }
 0x48c   : > { %v1572_v17 = vpack.c.bf16 %v2686_v3, %v2683_v61 }
 0x48e   : > { %v2687_v18 = vpop.f32.mrb[100].mxu1  ;;  %2889 = vmatprep.mubr.msk.bf16.mxu0 %vm902_vm0, %v1572_v17 }
 0x48f   : > { %v2688_v19 = vpop.f32.mrb[101].mxu1 }
 0x490   : > { %v2689_v20 = vadd.f32 %v2688_v19, %v2687_v18  ;;  %v2690_v21 = vpop.f32.mrb[102].mxu1 }
 0x491   : > { %v2691_v22 = vpop.f32.mrb[103].mxu1 }
 0x492   : > { %v2692_v23 = vadd.f32 %v2691_v22, %v2690_v21 }
 0x494   : > { %v1573_v24 = vpack.c.bf16 %v2692_v23, %v2689_v20 }
 0x496   : > { %2890 = vmatmul.mubr.msk.bf16.gmra.mrb[80].mxu0 %vm902_vm0, %v1573_v24  ;;  %v2693_v25 = vpop.f32.mrb[104].mxu1 }
 0x497   : > { %v2694_v26 = vpop.f32.mrb[105].mxu1 }
 0x498   : > { %v2695_v27 = vadd.f32 %v2694_v26, %v2693_v25  ;;  %v2696_v28 = vpop.f32.mrb[106].mxu1 }
 0x499   : > { %v2697_v29 = vpop.f32.mrb[107].mxu1 }
 0x49a   : > { %v2698_v30 = vadd.f32 %v2697_v29, %v2696_v28 }
 0x49c   : > { %v1574_v31 = vpack.c.bf16 %v2698_v30, %v2695_v27 }
 0x49e   : > { %v2699_v32 = vpop.f32.mrb[108].mxu1  ;;  %2893 = vmatprep.mubr.msk.bf16.mxu0 %vm902_vm0, %v1574_v31 }
 0x49f   : > { %v2700_v33 = vpop.f32.mrb[109].mxu1 }
 0x4a0   : > { %v2701_v34 = vadd.f32 %v2700_v33, %v2699_v32  ;;  %v2702_v35 = vpop.f32.mrb[110].mxu1 }
 0x4a1   : > { %v2703_v36 = vpop.f32.mrb[111].mxu1 }
 0x4a2   : > { %v2704_v37 = vadd.f32 %v2703_v36, %v2702_v35 }
 0x4a4   : > { %v1575_v38 = vpack.c.bf16 %v2704_v37, %v2701_v34 }
 0x4a6   : > { %2894 = vmatmul.mubr.msk.bf16.gmra.mrb[84].mxu0 %vm902_vm0, %v1575_v38  ;;  %v2705_v39 = vpop.f32.mrb[112].mxu1 }
 0x4a7   : > { %v2706_v40 = vpop.f32.mrb[113].mxu1 }
 0x4a8   : > { %v2707_v42 = vadd.f32 %v2706_v40, %v2705_v39  ;;  %v2708_v43 = vpop.f32.mrb[114].mxu1 }
 0x4a9   : > { %v2709_v45 = vpop.f32.mrb[115].mxu1 }
 0x4aa   : > { %v2710_v46 = vadd.f32 %v2709_v45, %v2708_v43 }
 0x4ac   : > { %v1576_v47 = vpack.c.bf16 %v2710_v46, %v2707_v42 }
 0x4ae   : > { %v2711_v48 = vpop.f32.mrb[116].mxu1  ;;  %2897 = vmatprep.mubr.msk.bf16.mxu0 %vm902_vm0, %v1576_v47 }
 0x4af   : > { %v2712_v49 = vpop.f32.mrb[117].mxu1 }
 0x4b0   : > { %v2713_v13 = vadd.f32 %v2712_v49, %v2711_v48  ;;  %v2714_v63 = vpop.f32.mrb[118].mxu1 }
 0x4b1   : > { %v2715_v0 = vpop.f32.mrb[119].mxu1 }
 0x4b2   : > { %v2716_v14 = vadd.f32 %v2715_v0, %v2714_v63 }
 0x4b4   : > { %v1577_v16 = vpack.c.bf16 %v2716_v14, %v2713_v13 }
 0x4b6   : > { %2898 = vmatmul.mubr.msk.bf16.gmra.mrb[88].mxu0 %vm902_vm0, %v1577_v16  ;;  %v2717_v15 = vpop.f32.mrb[120].mxu1 }
 0x4b7   : > { %v2718_v5 = vpop.f32.mrb[121].mxu1 }
 0x4b8   : > { %v2719_v6 = vadd.f32 %v2718_v5, %v2717_v15  ;;  %v2720_v7 = vpop.f32.mrb[122].mxu1 }
 0x4b9   : > { %v2721_v8 = vpop.f32.mrb[123].mxu1 }
 0x4ba   : > { %v2722_v9 = vadd.f32 %v2721_v8, %v2720_v7 }
 0x4bc   : > { %v1578_v12 = vpack.c.bf16 %v2722_v9, %v2719_v6 }
 0x4be   : > { %v2723_v10 = vpop.f32.mrb[124].mxu1  ;;  %2901 = vmatprep.mubr.msk.bf16.mxu0 %vm902_vm0, %v1578_v12 }
 0x4bf   : > { %v2724_v11 = vpop.f32.mrb[125].mxu1 }
 0x4c0   : > { %v2725_v41 = vadd.f32 %v2724_v11, %v2723_v10  ;;  %v2726_v44 = vpop.f32.mrb[126].mxu1 }
 0x4c1   : > { %v2727_v50 = vpop.f32.mrb[127].mxu1 }
 0x4c2   : > { %v2728_v51 = vadd.f32 %v2727_v50, %v2726_v44 }
 0x4c4   : > { %v1579_v52 = vpack.c.bf16 %v2728_v51, %v2725_v41 }
 0x4c6   : > { %2902 = vmatmul.mubr.msk.bf16.gmra.mrb[92].mxu0 %vm902_vm0, %v1579_v52 }
 0x529   : > { %v2875_v55 = vpop.f32.mrb[64].mxu0 }
 0x52a   : > { %v1671_v56 = vadd.f32 %v2875_v55, %v3533_v4  ;;  %v1662_v54 = vpop.f32.mrb[65].mxu0 }
 0x52b   : > { %v1663_v53 = vadd.f32 %v3533_v4, %v1662_v54  ;;  %v2876_v57 = vpop.f32.mrb[66].mxu0 }
 0x52c   : > { %v1674_v58 = vadd.f32 %v2876_v57, %v3533_v4  ;;  %v1665_v59 = vpop.f32.mrb[67].mxu0  ;;  %v1791_v61 = vmax.f32 %v1671_v56, 0.0 }
 0x52d   : > { %v1666_v60 = vadd.f32 %v3533_v4, %v1665_v59  ;;  %v1789_v2 = vmax.f32 %v1663_v53, 0.0 }
 0x52e   : > { %v1792_v62 = vmax.f32 %v1674_v58, 0.0 }
 0x52f   : > { %v1790_v3 = vmax.f32 %v1666_v60, 0.0 }
 0x530   : > { %v1822_v17 = vpack.c.bf16 %v1792_v62, %v1791_v61 }
 0x531   : > { %v1821_v18 = vpack.c.bf16 %v1790_v3, %v1789_v2 }
 0x533   : > { %2909 = vmatprep.mubr.msk.bf16.mxu0 %vm902_vm0, %v1821_v18 }
 0x534   : > { %2910 = vmatmul.mubr.msk.bf16.vlgmr.msra.gmra.mrb[96].mxu0 %vm902_vm0, %v1822_v17 }
 0x539   : > { %v2879_v19 = vpop.f32.mrb[68].mxu0 }
 0x53a   : > { %v1687_v20 = vadd.f32 %v2879_v19, %v3533_v4  ;;  %v1678_v21 = vpop.f32.mrb[69].mxu0 }
 0x53b   : > { %v1679_v22 = vadd.f32 %v3533_v4, %v1678_v21  ;;  %v2880_v23 = vpop.f32.mrb[70].mxu0 }
 0x53c   : > { %v1690_v24 = vadd.f32 %v2880_v23, %v3533_v4  ;;  %v1681_v25 = vpop.f32.mrb[71].mxu0  ;;  %v1795_v27 = vmax.f32 %v1687_v20, 0.0 }
 0x53d   : > { %v1682_v26 = vadd.f32 %v3533_v4, %v1681_v25  ;;  %v1793_v29 = vmax.f32 %v1679_v22, 0.0 }
 0x53e   : > { %v1796_v28 = vmax.f32 %v1690_v24, 0.0 }
 0x53f   : > { %v1794_v30 = vmax.f32 %v1682_v26, 0.0 }
 0x540   : > { %v1824_v31 = vpack.c.bf16 %v1796_v28, %v1795_v27 }
 0x541   : > { %v1823_v32 = vpack.c.bf16 %v1794_v30, %v1793_v29 }
 0x543   : > { %2913 = vmatprep.mubr.msk.bf16.mxu0 %vm902_vm0, %v1823_v32 }
 0x544   : > { %2914 = vmatmul.mubr.msk.bf16.gmra.mrb[100].mxu0 %vm902_vm0, %v1824_v31 }
 0x549   : > { %v2883_v33 = vpop.f32.mrb[72].mxu0 }
 0x54a   : > { %v1703_v34 = vadd.f32 %v2883_v33, %v3533_v4  ;;  %v1694_v35 = vpop.f32.mrb[73].mxu0 }
 0x54b   : > { %v1695_v36 = vadd.f32 %v3533_v4, %v1694_v35  ;;  %v2884_v37 = vpop.f32.mrb[74].mxu0 }
 0x54c   : > { %v1706_v38 = vadd.f32 %v2884_v37, %v3533_v4  ;;  %v1697_v39 = vpop.f32.mrb[75].mxu0  ;;  %v1799_v42 = vmax.f32 %v1703_v34, 0.0 }
 0x54d   : > { %v1698_v40 = vadd.f32 %v3533_v4, %v1697_v39  ;;  %v1797_v45 = vmax.f32 %v1695_v36, 0.0 }
 0x54e   : > { %v1800_v43 = vmax.f32 %v1706_v38, 0.0 }
 0x54f   : > { %v1798_v46 = vmax.f32 %v1698_v40, 0.0 }
 0x550   : > { %v1826_v47 = vpack.c.bf16 %v1800_v43, %v1799_v42 }
 0x551   : > { %v1825_v48 = vpack.c.bf16 %v1798_v46, %v1797_v45 }
 0x553   : > { %2917 = vmatprep.mubr.msk.bf16.mxu0 %vm902_vm0, %v1825_v48 }
 0x554   : > { %2918 = vmatmul.mubr.msk.bf16.gmra.mrb[104].mxu0 %vm902_vm0, %v1826_v47 }
 0x559   : > { %v2887_v49 = vpop.f32.mrb[76].mxu0 }
 0x55a   : > { %v1719_v13 = vadd.f32 %v2887_v49, %v3533_v4  ;;  %v1710_v63 = vpop.f32.mrb[77].mxu0 }
 0x55b   : > { %v1711_v0 = vadd.f32 %v3533_v4, %v1710_v63  ;;  %v2888_v14 = vpop.f32.mrb[78].mxu0 }
 0x55c   : > { %v1722_v16 = vadd.f32 %v2888_v14, %v3533_v4  ;;  %v1713_v15 = vpop.f32.mrb[79].mxu0  ;;  %v1803_v6 = vmax.f32 %v1719_v13, 0.0 }
 0x55d   : > { %v1714_v5 = vadd.f32 %v3533_v4, %v1713_v15  ;;  %v1801_v8 = vmax.f32 %v1711_v0, 0.0 }
 0x55e   : > { %v1804_v7 = vmax.f32 %v1722_v16, 0.0 }
 0x55f   : > { %v1802_v9 = vmax.f32 %v1714_v5, 0.0 }
 0x560   : > { %v1828_v12 = vpack.c.bf16 %v1804_v7, %v1803_v6  ;;  %v3069_v6 = vld [vmem:[%s3836_s8 + $0x4] ss:$8 sps:$4 sm:$0xff]  }
 0x561   : > { %v1827_v10 = vpack.c.bf16 %v1802_v9, %v1801_v8  ;;  %2118 = vmatprep.mubr.bf16.mxu1 %v3069_v6 }
 0x563   : > { %2921 = vmatprep.mubr.msk.bf16.mxu0 %vm902_vm0, %v1827_v10 }
 0x564   : > { %2922 = vmatmul.mubr.msk.bf16.gmra.mrb[108].mxu0 %vm902_vm0, %v1828_v12 }
 0x569   : > { %v2891_v11 = vpop.f32.mrb[80].mxu0 }
 0x56a   : > { %v1735_v41 = vadd.f32 %v2891_v11, %v3533_v4  ;;  %v1726_v44 = vpop.f32.mrb[81].mxu0 }
 0x56b   : > { %v1727_v50 = vadd.f32 %v3533_v4, %v1726_v44  ;;  %v2892_v51 = vpop.f32.mrb[82].mxu0 }
 0x56c   : > { %v1738_v52 = vadd.f32 %v2892_v51, %v3533_v4  ;;  %v1729_v55 = vpop.f32.mrb[83].mxu0  ;;  %v1807_v54 = vmax.f32 %v1735_v41, 0.0 }
 0x56d   : > { %v1730_v56 = vadd.f32 %v3533_v4, %v1729_v55  ;;  %v1805_v57 = vmax.f32 %v1727_v50, 0.0 }
 0x56e   : > { %v1808_v53 = vmax.f32 %v1738_v52, 0.0 }
 0x56f   : > { %v1806_v58 = vmax.f32 %v1730_v56, 0.0 }
 0x570   : > { %v1830_v59 = vpack.c.bf16 %v1808_v53, %v1807_v54 }
 0x571   : > { %v1829_v60 = vpack.c.bf16 %v1806_v58, %v1805_v57 }
 0x573   : > { %2925 = vmatprep.mubr.msk.bf16.mxu0 %vm902_vm0, %v1829_v60 }
 0x574   : > { %2926 = vmatmul.mubr.msk.bf16.gmra.mrb[112].mxu0 %vm902_vm0, %v1830_v59 }
 0x579   : > { %v2895_v61 = vpop.f32.mrb[84].mxu0 }
 0x57a   : > { %v1751_v62 = vadd.f32 %v2895_v61, %v3533_v4  ;;  %v1742_v2 = vpop.f32.mrb[85].mxu0 }
 0x57b   : > { %v1743_v3 = vadd.f32 %v3533_v4, %v1742_v2  ;;  %v2896_v17 = vpop.f32.mrb[86].mxu0 }
 0x57c   : > { %v1754_v18 = vadd.f32 %v2896_v17, %v3533_v4  ;;  %v1745_v19 = vpop.f32.mrb[87].mxu0  ;;  %v1811_v21 = vmax.f32 %v1751_v62, 0.0 }
 0x57d   : > { %v1746_v20 = vadd.f32 %v3533_v4, %v1745_v19  ;;  %v1809_v23 = vmax.f32 %v1743_v3, 0.0 }
 0x57e   : > { %v1812_v22 = vmax.f32 %v1754_v18, 0.0 }
 0x57f   : > { %v1810_v24 = vmax.f32 %v1746_v20, 0.0 }
 0x580   : > { %v1832_v25 = vpack.c.bf16 %v1812_v22, %v1811_v21 }
 0x581   : > { %v1831_v26 = vpack.c.bf16 %v1810_v24, %v1809_v23 }
 0x583   : > { %2929 = vmatprep.mubr.msk.bf16.mxu0 %vm902_vm0, %v1831_v26 }
 0x584   : > { %2930 = vmatmul.mubr.msk.bf16.gmra.mrb[116].mxu0 %vm902_vm0, %v1832_v25 }
 0x589   : > { %v2899_v27 = vpop.f32.mrb[88].mxu0 }
 0x58a   : > { %v1767_v28 = vadd.f32 %v2899_v27, %v3533_v4  ;;  %v1758_v29 = vpop.f32.mrb[89].mxu0 }
 0x58b   : > { %v1759_v30 = vadd.f32 %v3533_v4, %v1758_v29  ;;  %v2900_v31 = vpop.f32.mrb[90].mxu0 }
 0x58c   : > { %v1770_v32 = vadd.f32 %v2900_v31, %v3533_v4  ;;  %v1761_v33 = vpop.f32.mrb[91].mxu0  ;;  %v1815_v35 = vmax.f32 %v1767_v28, 0.0 }
 0x58d   : > { %v1762_v34 = vadd.f32 %v3533_v4, %v1761_v33  ;;  %v1813_v37 = vmax.f32 %v1759_v30, 0.0 }
 0x58e   : > { %v1816_v36 = vmax.f32 %v1770_v32, 0.0 }
 0x58f   : > { %v1814_v38 = vmax.f32 %v1762_v34, 0.0 }
 0x590   : > { %v1834_v39 = vpack.c.bf16 %v1816_v36, %v1815_v35 }
 0x591   : > { %v1833_v40 = vpack.c.bf16 %v1814_v38, %v1813_v37 }
 0x593   : > { %2933 = vmatprep.mubr.msk.bf16.mxu0 %vm902_vm0, %v1833_v40 }
 0x594   : > { %2934 = vmatmul.mubr.msk.bf16.gmra.mrb[120].mxu0 %vm902_vm0, %v1834_v39 }
 0x599   : > { %v2903_v42 = vpop.f32.mrb[92].mxu0 }
 0x59a   : > { %v1783_v43 = vadd.f32 %v2903_v42, %v3533_v4  ;;  %v1774_v45 = vpop.f32.mrb[93].mxu0 }
 0x59b   : > { %v1775_v46 = vadd.f32 %v3533_v4, %v1774_v45  ;;  %v2904_v47 = vpop.f32.mrb[94].mxu0 }
 0x59c   : > { %v1786_v48 = vadd.f32 %v2904_v47, %v3533_v4  ;;  %v1777_v49 = vpop.f32.mrb[95].mxu0  ;;  %v1819_v63 = vmax.f32 %v1783_v43, 0.0 }
 0x59d   : > { %v1778_v13 = vadd.f32 %v3533_v4, %v1777_v49  ;;  %v1817_v14 = vmax.f32 %v1775_v46, 0.0 }
 0x59e   : > { %v1820_v0 = vmax.f32 %v1786_v48, 0.0 }
 0x59f   : > { %v1818_v16 = vmax.f32 %v1778_v13, 0.0 }
 0x5a0   : > { %v1836_v15 = vpack.c.bf16 %v1820_v0, %v1819_v63 }
 0x5a1   : > { %v1835_v5 = vpack.c.bf16 %v1818_v16, %v1817_v14 }
 0x5a3   : > { %2937 = vmatprep.mubr.msk.bf16.mxu0 %vm902_vm0, %v1835_v5 }
 0x5a4   : > { %2938 = vmatmul.mubr.msk.bf16.gmra.mrb[124].mxu0 %vm902_vm0, %v1836_v15 }
 0x607   : > { %v2911_v7 = vpop.f32.mrb[96].mxu0 }
 0x608   : > { %v1919_v8 = vpop.f32.mrb[97].mxu0  ;;  %v1928_v4 = vadd.f32 %v2911_v7, %v3587_v1 }
 0x609   : > { %v2912_v9 = vpop.f32.mrb[98].mxu0  ;;  %v1920_v11 = vadd.f32 %v3587_v1, %v1919_v8 }
 0x60a   : > { %v1931_v12 = vadd.f32 %v2912_v9, %v3587_v1  ;;  %v1922_v10 = vpop.f32.mrb[99].mxu0 }
 0x60b   : > { %v1923_v41 = vadd.f32 %v3587_v1, %v1922_v10 }
 0x60c   : > { %v2047_v44 = vpack.c.bf16 %v1931_v12, %v1928_v4 }
 0x60d   : > { %v2046_v50 = vpack.c.bf16 %v1923_v41, %v1920_v11 }
 0x617   : > { %v2915_v51 = vpop.f32.mrb[100].mxu0 }
 0x618   : > { %v1935_v52 = vpop.f32.mrb[101].mxu0  ;;  %v1944_v56 = vadd.f32 %v2915_v51, %v3587_v1 }
 0x619   : > { %v2916_v55 = vpop.f32.mrb[102].mxu0  ;;  %v1936_v57 = vadd.f32 %v3587_v1, %v1935_v52 }
 0x61a   : > { %v1947_v54 = vadd.f32 %v2916_v55, %v3587_v1  ;;  %v1938_v53 = vpop.f32.mrb[103].mxu0 }
 0x61b   : > { %v1939_v58 = vadd.f32 %v3587_v1, %v1938_v53 }
 0x61c   : > { %v2049_v59 = vpack.c.bf16 %v1947_v54, %v1944_v56 }
 0x61d   : > { %v2048_v60 = vpack.c.bf16 %v1939_v58, %v1936_v57  ;;  %v3067_v58 = vld [vmem:[%s3836_s8] ss:$8 sps:$4 sm:$0xff]  }
 0x627   : > { %v2919_v61 = vpop.f32.mrb[104].mxu0 }
 0x628   : > { %v1951_v62 = vpop.f32.mrb[105].mxu0  ;;  %v1960_v3 = vadd.f32 %v2919_v61, %v3587_v1  ;;  %v3074_v61 = vld [vmem:[%s3834_s6 + $0x8] sm:$0xff]  }
 0x629   : > { %v2920_v2 = vpop.f32.mrb[106].mxu0  ;;  %v1952_v19 = vadd.f32 %v3587_v1, %v1951_v62 }
 0x62a   : > { %v1963_v17 = vadd.f32 %v2920_v2, %v3587_v1  ;;  %v1954_v18 = vpop.f32.mrb[107].mxu0 }
 0x62b   : > { %v1955_v20 = vadd.f32 %v3587_v1, %v1954_v18 }
 0x62c   : > { %v2051_v21 = vpack.c.bf16 %v1963_v17, %v1960_v3 }
 0x62d   : > { %v2050_v22 = vpack.c.bf16 %v1955_v20, %v1952_v19 }
 0x637   : > { %v2923_v23 = vpop.f32.mrb[108].mxu0 }
 0x638   : > { %v1967_v24 = vpop.f32.mrb[109].mxu0  ;;  %v3735_v26 = vadd.f32 %v2923_v23, %v3587_v1 }
 0x639   : > { %v2924_v25 = vpop.f32.mrb[110].mxu0  ;;  %v1968_v29 = vadd.f32 %v3587_v1, %v1967_v24 }
 0x63a   : > { %v1979_v27 = vadd.f32 %v2924_v25, %v3587_v1  ;;  %v1970_v28 = vpop.f32.mrb[111].mxu0 }
 0x63b   : > { %v1971_v30 = vadd.f32 %v3587_v1, %v1970_v28 }
 0x63c   : > { %v2053_v31 = vpack.c.bf16 %v1979_v27, %v3735_v26 }
 0x63d   : > { %v2052_v32 = vpack.c.bf16 %v1971_v30, %v1968_v29 }
 0x647   : > { %v2927_v33 = vpop.f32.mrb[112].mxu0 }
 0x648   : > { %v1983_v34 = vpop.f32.mrb[113].mxu0  ;;  %v1992_v36 = vadd.f32 %v2927_v33, %v3587_v1 }
 0x649   : > { %v2928_v35 = vpop.f32.mrb[114].mxu0  ;;  %v1984_v39 = vadd.f32 %v3587_v1, %v1983_v34 }
 0x64a   : > { %v1995_v37 = vadd.f32 %v2928_v35, %v3587_v1  ;;  %v1986_v38 = vpop.f32.mrb[115].mxu0 }
 0x64b   : > { %v1987_v40 = vadd.f32 %v3587_v1, %v1986_v38 }
 0x64c   : > { %v2055_v42 = vpack.c.bf16 %v1995_v37, %v1992_v36 }
 0x64d   : > { %v2054_v43 = vpack.c.bf16 %v1987_v40, %v1984_v39 }
 0x64f   : > { %2765 = vmatprep.subr.bf16.mxu1 %v2054_v43 }
 0x650   : > { %2766 = vmatpush3.bf16.msra.mxu1 %v2046_v50 }
 0x651   : > { %2767 = vmatprep.subr.bf16.mxu1 %v2055_v42 }
 0x654   : > { %2768 = vmatpush3.bf16.msra.mxu1 %v2047_v44 }
 0x657   : > { %v2931_v45 = vpop.f32.mrb[116].mxu0 }
 0x658   : > { %v1999_v46 = vpop.f32.mrb[117].mxu0  ;;  %v2008_v48 = vadd.f32 %v2931_v45, %v3587_v1 }
 0x659   : > { %v2932_v47 = vpop.f32.mrb[118].mxu0  ;;  %v2000_v63 = vadd.f32 %v3587_v1, %v1999_v46 }
 0x65a   : > { %v2011_v49 = vadd.f32 %v2932_v47, %v3587_v1  ;;  %v2002_v13 = vpop.f32.mrb[119].mxu0 }
 0x65b   : > { %v2003_v0 = vadd.f32 %v3587_v1, %v2002_v13 }
 0x65c   : > { %v2057_v14 = vpack.c.bf16 %v2011_v49, %v2008_v48 }
 0x65d   : > { %v2056_v16 = vpack.c.bf16 %v2003_v0, %v2000_v63 }
 0x65f   : > { %2769 = vmatprep.subr.bf16.mxu1 %v2056_v16 }
 0x660   : > { %2770 = vmatpush3.bf16.msra.mxu1 %v2048_v60  ;;  %v3073_v60 = vld [vmem:[%s3834_s6] sm:$0xff]  }
 0x661   : > { %2771 = vmatprep.subr.bf16.mxu1 %v2057_v14 }
 0x664   : > { %2772 = vmatpush3.bf16.msra.mxu1 %v2049_v59  ;;  %v3070_v59 = vld [vmem:[%s3836_s8 + $0x14] ss:$8 sps:$4 sm:$0xff]  }
 0x667   : > { %v2935_v15 = vpop.f32.mrb[120].mxu0 }
 0x668   : > { %v2015_v5 = vpop.f32.mrb[121].mxu0  ;;  %v2024_v7 = vadd.f32 %v2935_v15, %v3587_v1 }
 0x669   : > { %v2936_v6 = vpop.f32.mrb[122].mxu0  ;;  %v2016_v4 = vadd.f32 %v3587_v1, %v2015_v5 }
 0x66a   : > { %v2027_v8 = vadd.f32 %v2936_v6, %v3587_v1  ;;  %v2018_v9 = vpop.f32.mrb[123].mxu0 }
 0x66b   : > { %v2019_v12 = vadd.f32 %v3587_v1, %v2018_v9 }
 0x66c   : > { %v2059_v10 = vpack.c.bf16 %v2027_v8, %v2024_v7 }
 0x66d   : > { %v2058_v11 = vpack.c.bf16 %v2019_v12, %v2016_v4 }
 0x66f   : > { %2773 = vmatprep.subr.bf16.mxu1 %v2058_v11 }
 0x670   : > { %2774 = vmatpush3.bf16.msra.mxu1 %v2050_v22 }
 0x671   : > { %2775 = vmatprep.subr.bf16.mxu1 %v2059_v10 }
 0x674   : > { %2776 = vmatpush3.bf16.msra.mxu1 %v2051_v21 }
 0x677   : > { %v2939_v41 = vpop.f32.mrb[124].mxu0 }
 0x678   : > { %v2031_v44 = vpop.f32.mrb[125].mxu0  ;;  %v2040_v51 = vadd.f32 %v2939_v41, %v3587_v1 }
 0x679   : > { %v2940_v50 = vpop.f32.mrb[126].mxu0  ;;  %v2032_v56 = vadd.f32 %v3587_v1, %v2031_v44 }
 0x67a   : > { %v2043_v52 = vadd.f32 %v2940_v50, %v3587_v1  ;;  %v2034_v55 = vpop.f32.mrb[127].mxu0 }
 0x67b   : > { %v2035_v54 = vadd.f32 %v3587_v1, %v2034_v55  ;;  %v3072_v1 = vld [vmem:[%s3836_s8 + $0x10] ss:$8 sps:$4 sm:$0xff]  }
 0x67c   : > { %v2061_v53 = vpack.c.bf16 %v2043_v52, %v2040_v51 }
 0x67d   : > { %v2060_v57 = vpack.c.bf16 %v2035_v54, %v2032_v56 }
 0x67f   : > { %2777 = vmatprep.subr.bf16.mxu1 %v2060_v57 }
 0x680   : > { %2778 = vmatpush3.bf16.msra.mxu1 %v2052_v32  ;;  %v2456_v32 = vld [vmem:[%s3835_s7] ss:$0 sm:$0xff] }
 0x681   : > { %2779 = vmatprep.subr.bf16.mxu1 %v2061_v53 }
 0x684   : > { %2780 = vmatpush3.bf16.msra.mxu1 %v2053_v31 }
 0x685   : > { %2941 = vmatprep.subr.bf16.mxu1 %v3073_v60 }
 0x687   : > { %2119 = vmatmul.mubr.bf16.vlgmr.msra.gmra.mrb[128].mxu1 %v3067_v58 }
 0x688   : > { %2126 = vmatprep.mubr.bf16.mxu1 %v3070_v59  ;;  %2942 = vmatpush3.bf16.msra.mxu1 %v3073_v60 }
 0x689   : > { %2943 = vmatprep.subr.bf16.mxu1 %v3074_v61 }
 0x68c   : > { %2944 = vmatpush3.bf16.msra.mxu1 %v3074_v61 }
 0x68f   : > { %2127 = vmatmul.mubr.bf16.gmra.mrb[132].mxu1 %v3072_v1 }
 0x75a   : > { %v2781_v62 = vpop.f32.mrb[128].mxu1 }
 0x75b   : > { %v2782_v2 = vpop.f32.mrb[129].mxu1 }
 0x75c   : > { %v2783_v3 = vadd.f32 %v2782_v2, %v2781_v62  ;;  %v2784_v17 = vpop.f32.mrb[130].mxu1 }
 0x75d   : > { %v2785_v18 = vpop.f32.mrb[131].mxu1 }
 0x75e   : > { %v2786_v19 = vadd.f32 %v2785_v18, %v2784_v17  ;;  %v2135_v20 = vmul.f32 0.125, %v2783_v3 }
 0x760   : > { %v2136_v21 = vmul.f32 0.125, %v2786_v19 }
 0x762   : > { %v2139_v22 = vpack.c.bf16 %v2136_v21, %v2135_v20  ;;  %v2787_v23 = vpop.f32.mrb[132].mxu1 }
 0x763   : > { %v2788_v24 = vpop.f32.mrb[133].mxu1 }
 0x764   : > { %v2789_v25 = vadd.f32 %v2788_v24, %v2787_v23  ;;  %v2790_v26 = vpop.f32.mrb[134].mxu1  ;;  %2945 = vmatprep.mubr.msk.bf16.mxu1 %vm902_vm0, %v2139_v22 }
 0x765   : > { %v2791_v27 = vpop.f32.mrb[135].mxu1 }
 0x766   : > { %v2792_v28 = vadd.f32 %v2791_v27, %v2790_v26  ;;  %v2137_v29 = vmul.f32 0.125, %v2789_v25 }
 0x768   : > { %v2138_v30 = vmul.f32 0.125, %v2792_v28 }
 0x76a   : > { %v2140_v31 = vpack.c.bf16 %v2138_v30, %v2137_v29 }
 0x76c   : > { %2946 = vmatmul.mubr.msk.bf16.vlgmr.msra.gmra.mrb[136].mxu1 %vm902_vm0, %v2140_v31 }
 0x83f   : > { %v2947_v33 = vpop.f32.mrb[136].mxu1 }
 0x840   : > { %v2213_v34 = vadd.f32 %v2947_v33, %v2456_v32  ;;  %v2204_v35 = vpop.f32.mrb[137].mxu1 }
 0x841   : > { %v2205_v36 = vadd.f32 %v2456_v32, %v2204_v35  ;;  %v2948_v37 = vpop.f32.mrb[138].mxu1 }
 0x842   : > { %2221 = vst [vmem:[%s367_s19 + $0x10] sm:$0xff] %v2213_v34  ;;  %v2216_v38 = vadd.f32 %v2948_v37, %v2456_v32  ;;  %v2207_v39 = vpop.f32.mrb[139].mxu1 }
 0x843   : > { %2219 = vst [vmem:[%s367_s19] sm:$0xff] %v2205_v36  ;;  %v2208_v40 = vadd.f32 %v2456_v32, %v2207_v39 }
 0x844   : > { %2222 = vst [vmem:[%s367_s19 + $0x18] sm:$0xff] %v2216_v38 }
 0x845   : > { %2220 = vst [vmem:[%s367_s19 + $0x8] sm:$0xff] %v2208_v40 }
 0x846   : > { %3118 = shalt.err (!%p3115_p4)
}
 0x847   : > { %s3119_s24 = scalar_lea.hbm %s3784_s27, 512  ;;  %s3123_s16 = scalar_lea.hbm %s3837_s9, 1024 }
 0x848   : > { %p3120_p5 = scmp.ne.s32.totalorder %s3784_s27, %s3119_s24  ;;  %p3124_p1 = scmp.lt.u32.totalorder %s3784_s27, %s3837_s9 }
 0x849   : > { %p3125_p3 = scmp.lt.u32.totalorder %s3123_s16, %s3119_s24  ;;  %p3127_p6 = scmp.lt.u32.totalorder %s3119_s24, %s3784_s27 }
 0x84a   : > { %p3121_p7 = pnand %p3120_p5, %p3844_p12 }
 0x84b   : > { %p3126_p11 = por %p3125_p3, %p3124_p1 }
 0x84c   : > { %p3122_p9 = pneg %p3121_p7 }
 0x84d   : > { %p3128_p13 = por %p3127_p6, %p3126_p11 }
 0x84f   : > { %p3129_p8 = pnand %p3128_p13, %p3122_p9 }
 0x851   : > { %3132 = shalt.err (!%p3129_p8)
}
 0x852   : > { %s3177_s20 = smov 128   ;;  %s3178_s25 = smov 8  }
 0x853   : > { %2951 = dma.vmem_to_hbm [thread:$0]  (%p3844_p12), %s3779_s28, 512, %s3784_s27, %s2224_s13, %s3177_s20, %s3177_s20, %s3178_s25  }
 0x854 PF: > { %s2252_s23 = sand.u32 1, %s3159_s30   ;;  %p3845_p10 = scmp.ne.s32.totalorder %s3842_s22, 0 }
 0x855   : > { %p3846_p0 = scmp.ge.s32.totalorder %s3171_s12, 2  ;;  %s2253_s24 = scalar_lea.sflag [#allocation4], %s2252_s23 }
 0x857   : > { %p2958_p2 = pnand %p3846_p0, %p3845_p10 }
 0x859   : > { %3154 = dma.done.wait (!%p2958_p2), %s2253_s24, 512  }
 0x85a   : > { %3156 = vsyncadd (!%p2958_p2), %s2253_s24, 4294966784  ;;  %p22_p4 = scmp.ge.s32.totalorder %s3254_s15, 4   ;;  %s3847_s30 = smov %s3163_s10 }
 0x85b   : > { %s3848_s10 = smov %s3167_s11  ;;  %s3849_s11 = smov %s3266_s18 }
 0x85c   : > { %s3850_s12 = smov %s3254_s15  ;;  %24 = sbr.rel (!%p22_p4) target bundleno = 5 (0x5), region = 104 }
 0x863   :  { %2258 = vsyncpa [#allocation3], 1 }
 0x864   :  { %2260 = vsyncpa [#allocation3 + $0x1], 1 }
 0x865   :  { %2261 = vsyncpa [#allocation4], 1 }
 0x866   :  { %2263 = vsyncpa [#allocation4 + $0x1], 1 }

</bundles_post_ra>
